<compile_context>
chip_gen: v5e
topology: v5e:2x2
jax: 0.10.0
libtpu: 0.0.40
codegen_flags: <defaults>
</compile_context>

<pallas_src>
import functools

import jax
import jax.numpy as jnp
import numpy as np
from jax.experimental import pallas as pl
from jax.experimental.pallas import tpu as pltpu


# ----------------------------------------------------------------------------
# Fused forward kernel: everything VMEM-resident, one invocation.
# ----------------------------------------------------------------------------
def fused_critic_kernel(
    pa_ref, rw_ref, ob_ref, ca_ref,
    w_act_ref, b_act_ref, w_rew_ref, b_rew_ref, w_obs_ref, b_obs_ref,
    w_ih_a_ref, w_ih_r_ref, w_ih_s_ref, b_ih_ref,
    w_hh_ref, b_hh_ref,
    w_sc_o_ref, w_sc_a_ref, b_sc_ref,
    wq_h_ref, wq_s_ref, bq1_ref,
    *rest,
    n_q_tail, t_len, t_q, batch, hidden,
):
    q_tail = rest[: 2 * n_q_tail]          # (w, b) for fused Q layers 2..L
    out_ref = rest[2 * n_q_tail]           # (t_q*batch, 2)
    hid_scratch = rest[2 * n_q_tail + 1]   # (t_len*batch, hidden) VMEM scratch

    f32 = jnp.float32
    dot = lambda a, b: jnp.dot(a, b, preferred_element_type=f32)
    relu = lambda x: jnp.maximum(x, 0.0)

    # ---- feature embedders (Linear + ReLU) ---------------------------------
    ea = relu(dot(pa_ref[...], w_act_ref[...]) + b_act_ref[...])      # (T*B, a_emb)
    er = relu(rw_ref[...] * w_rew_ref[...] + b_rew_ref[...])          # (T*B, r_emb), K==1 -> VPU
    es = relu(dot(ob_ref[...], w_obs_ref[...]) + b_obs_ref[...])      # (T*B, o_emb)

    # ---- GRU input projection (concat replaced by row-split W_ih^T) --------
    x_proj = (dot(ea, w_ih_a_ref[...]) + dot(er, w_ih_r_ref[...])
              + dot(es, w_ih_s_ref[...]) + b_ih_ref[...])             # (T*B, 3H)

    # ---- GRU recurrence (PyTorch gate order r, z, n; h0 = 0) ---------------
    w_hh = w_hh_ref[...]
    b_hh = b_hh_ref[...]
    h = jnp.zeros((batch, hidden), f32)
    for t in range(t_len):                                            # static unroll
        xp = x_proj[t * batch:(t + 1) * batch, :]
        hpj = dot(h, w_hh) + b_hh
        xr, xz, xn = xp[:, :hidden], xp[:, hidden:2 * hidden], xp[:, 2 * hidden:]
        hr, hz, hn = hpj[:, :hidden], hpj[:, hidden:2 * hidden], hpj[:, 2 * hidden:]
        r = jax.nn.sigmoid(xr + hr)
        z = jax.nn.sigmoid(xz + hz)
        n = jnp.tanh(xn + r * hn)        # tanh(W_in x + b_in + r*(W_hn h + b_hn))
        h = (1.0 - z) * n + z * h
        hid_scratch[t * batch:(t + 1) * batch, :] = h

    # ---- shortcut embedder (concat replaced by row-split W_sc) -------------
    nq = t_q * batch
    sc = relu(dot(ob_ref[0:nq, :], w_sc_o_ref[...])
              + dot(ca_ref[...], w_sc_a_ref[...]) + b_sc_ref[...])    # (T_q*B, sc_out)

    # ---- twin Q heads, fused along the output dimension ---------------------
    hid = hid_scratch[0:nq, :]                                        # (T_q*B, H)
    hq = relu(dot(hid, wq_h_ref[...]) + dot(sc, wq_s_ref[...]) + bq1_ref[...])
    for li in range(n_q_tail):
        hq = dot(hq, q_tail[2 * li][...]) + q_tail[2 * li + 1][...]
        if li < n_q_tail - 1:
            hq = relu(hq)
    out_ref[...] = hq.astype(out_ref.dtype)   # column 0 = q1, column 1 = q2


# ----------------------------------------------------------------------------
# Wrapper: flatten to time-major 2D slabs, one pallas_call, split q1/q2.
# ----------------------------------------------------------------------------
def critic_rnn_forward(fused, prev_actions, rewards, observs, current_actions):
    t_len, batch, _ = observs.shape
    t_q = current_actions.shape[0]            # T+1 (all steps) or T ([:-1] path)
    hidden = fused["w_hh"].shape[0]
    n_q_tail = len(fused["q_rest"]) // 2

    flat = lambda x: x.reshape(x.shape[0] * x.shape[1], x.shape[2])
    args = [
        flat(prev_actions), flat(rewards), flat(observs), flat(current_actions),
        fused["w_act"], fused["b_act"], fused["w_rew"], fused["b_rew"],
        fused["w_obs"], fused["b_obs"],
        fused["w_ih_a"], fused["w_ih_r"], fused["w_ih_s"], fused["b_ih"],
        fused["w_hh"], fused["b_hh"],
        fused["w_sc_o"], fused["w_sc_a"], fused["b_sc"],
        fused["wq_h"], fused["wq_s"], fused["bq1"], *fused["q_rest"],
    ]

    kernel = functools.partial(
        fused_critic_kernel, n_q_tail=n_q_tail,
        t_len=t_len, t_q=t_q, batch=batch, hidden=hidden)

    out = pl.pallas_call(
        kernel,
        out_shape=jax.ShapeDtypeStruct((t_q * batch, 2), jnp.float32),
        grid=(1,),
        in_specs=[pl.BlockSpec(a.shape, lambda i: (0, 0)) for a in args],
        out_specs=pl.BlockSpec((t_q * batch, 2), lambda i: (0, 0)),
        scratch_shapes=[pltpu.VMEM((t_len * batch, hidden), jnp.float32)],
        compiler_params=pltpu.CompilerParams(dimension_semantics=("arbitrary",)),
    )(*args)

    q1 = out[:, 0:1].reshape(t_q, batch, 1)
    q2 = out[:, 1:2].reshape(t_q, batch, 1)
    return q1, q2


# ----------------------------------------------------------------------------
# Parameter init (module-structured) + one-time fusion into kernel layout
# ----------------------------------------------------------------------------
def init_params(key, obs_dim, action_dim, a_emb, o_emb, r_emb, hidden, dqn_layers):
    rnn_in = a_emb + o_emb + r_emb
    shortcut_in = obs_dim + action_dim            # continuous action, no image encoder
    shortcut_out = rnn_in
    q_in = hidden + shortcut_out

    keys = iter(jax.random.split(key, 64))

    def w(shape, scale=0.1):
        return (scale * jax.random.normal(next(keys), shape)).astype(jnp.float32)

    def mlp(in_dim, hidden_sizes, out_dim):
        dims = [in_dim] + list(hidden_sizes) + [out_dim]
        return [(w((dims[i], dims[i + 1])), w((1, dims[i + 1]), 0.01))
                for i in range(len(dims) - 1)]

    return dict(
        # FeatureExtractors (Linear + ReLU)
        w_act=w((action_dim, a_emb)), b_act=w((1, a_emb), 0.01),
        w_rew=w((1, r_emb)),          b_rew=w((1, r_emb), 0.01),
        w_obs=w((obs_dim, o_emb)),    b_obs=w((1, o_emb), 0.01),
        # GRU (module uses nn.init.constant_(bias, 0))
        w_ih_t=w((rnn_in, 3 * hidden)), b_ih=jnp.zeros((1, 3 * hidden), jnp.float32),
        w_hh_t=w((hidden, 3 * hidden)), b_hh=jnp.zeros((1, 3 * hidden), jnp.float32),
        # shortcut embedder
        w_sc=w((shortcut_in, shortcut_out)), b_sc=w((1, shortcut_out), 0.01),
        # twin Q MLPs
        qf1=mlp(q_in, dqn_layers, 1),
        qf2=mlp(q_in, dqn_layers, 1),
    )


def fuse_params(params, *, obs_dim, a_emb, r_emb):
    """One-time rewrite of module-structured params into the concat-free kernel layout."""
    hidden = params["w_hh_t"].shape[0]
    w_ih = params["w_ih_t"]                    # rows ordered [a_emb | r_emb | o_emb]
    w_sc = params["w_sc"]                      # rows ordered [obs_dim | action_dim]

    def block_diag(w1, w2):
        z12 = jnp.zeros((w1.shape[0], w2.shape[1]), w1.dtype)
        z21 = jnp.zeros((w2.shape[0], w1.shape[1]), w2.dtype)
        return jnp.block([[w1, z12], [z21, w2]])

    (w1a, b1a), (w1b, b1b) = params["qf1"][0], params["qf2"][0]
    q_rest = []
    for (wa, ba), (wb, bb) in zip(params["qf1"][1:], params["qf2"][1:]):
        q_rest.append(block_diag(wa, wb))
        q_rest.append(jnp.concatenate([ba, bb], axis=1))

    return dict(
        w_act=params["w_act"], b_act=params["b_act"],
        w_rew=params["w_rew"], b_rew=params["b_rew"],
        w_obs=params["w_obs"], b_obs=params["b_obs"],
        w_ih_a=w_ih[:a_emb], w_ih_r=w_ih[a_emb:a_emb + r_emb],
        w_ih_s=w_ih[a_emb + r_emb:], b_ih=params["b_ih"],
        w_hh=params["w_hh_t"], b_hh=params["b_hh"],
        w_sc_o=w_sc[:obs_dim], w_sc_a=w_sc[obs_dim:], b_sc=params["b_sc"],
        wq_h=jnp.concatenate([w1a[:hidden], w1b[:hidden]], axis=1),
        wq_s=jnp.concatenate([w1a[hidden:], w1b[hidden:]], axis=1),
        bq1=jnp.concatenate([b1a, b1b], axis=1),
        q_rest=tuple(q_rest),
    )


# ----------------------------------------------------------------------------
# Pure-JAX reference (mirrors the PyTorch module) for correctness checking
# ----------------------------------------------------------------------------
def critic_rnn_reference(params, prev_actions, rewards, observs, current_actions):
    prec = jax.lax.Precision.HIGHEST
    dot = lambda a, b: jnp.dot(a, b, precision=prec)
    relu = jax.nn.relu
    t_len, batch, _ = observs.shape
    hidden = params["w_hh_t"].shape[0]

    ea = relu(dot(prev_actions, params["w_act"]) + params["b_act"])
    er = relu(dot(rewards, params["w_rew"]) + params["b_rew"])
    es = relu(dot(observs, params["w_obs"]) + params["b_obs"])
    inputs = jnp.concatenate([ea, er, es], axis=-1)
    x_proj = dot(inputs, params["w_ih_t"]) + params["b_ih"]

    def step(h, xp):
        hpj = dot(h, params["w_hh_t"]) + params["b_hh"]
        xr, xz, xn = jnp.split(xp, 3, axis=-1)
        hr, hz, hn = jnp.split(hpj, 3, axis=-1)
        r = jax.nn.sigmoid(xr + hr)
        z = jax.nn.sigmoid(xz + hz)
        n = jnp.tanh(xn + r * hn)
        h = (1.0 - z) * n + z * h
        return h, h

    _, hs = jax.lax.scan(step, jnp.zeros((batch, hidden), jnp.float32), x_proj)

    if current_actions.shape[0] == t_len:
        obs_sc, hid = observs, hs
    else:
        obs_sc, hid = observs[:-1], hs[:-1]
    sc = relu(dot(jnp.concatenate([obs_sc, current_actions], axis=-1), params["w_sc"])
              + params["b_sc"])
    joint = jnp.concatenate([hid, sc], axis=-1)

    def qf(x, layers):
        h = x
        for w_, b_ in layers[:-1]:
            h = relu(dot(h, w_) + b_)
        w_, b_ = layers[-1]
        return dot(h, w_) + b_

    return qf(joint, params["qf1"]), qf(joint, params["qf2"])


# ----------------------------------------------------------------------------
if __name__ == "__main__":
    T_PLUS_1, B = 8, 2
    OBS_DIM, ACT_DIM = 10, 4
    A_EMB, O_EMB, R_EMB = 8, 16, 8
    HIDDEN = 32
    DQN_LAYERS = (32, 32)

    key = jax.random.PRNGKey(0)
    kp, ka, kr, ko, kc = jax.random.split(key, 5)

    params = init_params(kp, OBS_DIM, ACT_DIM, A_EMB, O_EMB, R_EMB, HIDDEN, DQN_LAYERS)
    fused = fuse_params(params, obs_dim=OBS_DIM, a_emb=A_EMB, r_emb=R_EMB)  # one-time

    prev_actions = jax.random.normal(ka, (T_PLUS_1, B, ACT_DIM), jnp.float32)
    rewards = jax.random.normal(kr, (T_PLUS_1, B, 1), jnp.float32)
    observs = jax.random.normal(ko, (T_PLUS_1, B, OBS_DIM), jnp.float32)
    current_actions = jax.random.normal(kc, (T_PLUS_1, B, ACT_DIM), jnp.float32)

    q1, q2 = jax.jit(critic_rnn_forward)(
        fused, prev_actions, rewards, observs, current_actions)
    jax.block_until_ready((q1, q2))

    assert q1.shape == (T_PLUS_1, B, 1) and q2.shape == (T_PLUS_1, B, 1)
    assert q1.dtype == jnp.float32 and q2.dtype == jnp.float32

    # numerical check against a pure-JAX replica of the PyTorch module
    r1, r2 = jax.jit(critic_rnn_reference)(
        params, prev_actions, rewards, observs, current_actions)
    np.testing.assert_allclose(np.asarray(q1), np.asarray(r1), rtol=5e-2, atol=5e-3)
    np.testing.assert_allclose(np.asarray(q2), np.asarray(r2), rtol=5e-2, atol=5e-3)

    print("KERNEL_OK")
</pallas_src>

<mosaic_0001>
module attributes {stable_mosaic.version = 11 : i64} {
  func.func @fused_critic_kernel(%arg0: i32, %arg1: memref<16x4xf32, #tpu.memory_space<vmem>>, %arg2: memref<16x1xf32, #tpu.memory_space<vmem>>, %arg3: memref<16x10xf32, #tpu.memory_space<vmem>>, %arg4: memref<16x4xf32, #tpu.memory_space<vmem>>, %arg5: memref<4x8xf32, #tpu.memory_space<vmem>>, %arg6: memref<1x8xf32, #tpu.memory_space<vmem>>, %arg7: memref<1x8xf32, #tpu.memory_space<vmem>>, %arg8: memref<1x8xf32, #tpu.memory_space<vmem>>, %arg9: memref<10x16xf32, #tpu.memory_space<vmem>>, %arg10: memref<1x16xf32, #tpu.memory_space<vmem>>, %arg11: memref<8x96xf32, #tpu.memory_space<vmem>>, %arg12: memref<8x96xf32, #tpu.memory_space<vmem>>, %arg13: memref<16x96xf32, #tpu.memory_space<vmem>>, %arg14: memref<1x96xf32, #tpu.memory_space<vmem>>, %arg15: memref<32x96xf32, #tpu.memory_space<vmem>>, %arg16: memref<1x96xf32, #tpu.memory_space<vmem>>, %arg17: memref<10x32xf32, #tpu.memory_space<vmem>>, %arg18: memref<4x32xf32, #tpu.memory_space<vmem>>, %arg19: memref<1x32xf32, #tpu.memory_space<vmem>>, %arg20: memref<32x64xf32, #tpu.memory_space<vmem>>, %arg21: memref<32x64xf32, #tpu.memory_space<vmem>>, %arg22: memref<1x64xf32, #tpu.memory_space<vmem>>, %arg23: memref<64x64xf32, #tpu.memory_space<vmem>>, %arg24: memref<1x64xf32, #tpu.memory_space<vmem>>, %arg25: memref<64x2xf32, #tpu.memory_space<vmem>>, %arg26: memref<1x2xf32, #tpu.memory_space<vmem>>, %arg27: memref<16x2xf32, #tpu.memory_space<vmem>>, %arg28: memref<16x32xf32, #tpu.memory_space<vmem>>) attributes {dimension_semantics = [#tpu.dimension_semantics<arbitrary>], iteration_bounds = array<i64: 1>, scalar_prefetch = 0 : i64, scratch_operands = 1 : i64, tpu.core_type = #tpu.core_type<tc>, window_params = [{pipeline_mode = #tpu.pipeline_mode<synchronous>, transform_indices = @transform_0, window_bounds = array<i64: 16, 4>}, {pipeline_mode = #tpu.pipeline_mode<synchronous>, transform_indices = @transform_1, window_bounds = array<i64: 16, 1>}, {pipeline_mode = #tpu.pipeline_mode<synchronous>, transform_indices = @transform_2, window_bounds = array<i64: 16, 10>}, {pipeline_mode = #tpu.pipeline_mode<synchronous>, transform_indices = @transform_3, window_bounds = array<i64: 16, 4>}, {pipeline_mode = #tpu.pipeline_mode<synchronous>, transform_indices = @transform_4, window_bounds = array<i64: 4, 8>}, {pipeline_mode = #tpu.pipeline_mode<synchronous>, transform_indices = @transform_5, window_bounds = array<i64: 1, 8>}, {pipeline_mode = #tpu.pipeline_mode<synchronous>, transform_indices = @transform_6, window_bounds = array<i64: 1, 8>}, {pipeline_mode = #tpu.pipeline_mode<synchronous>, transform_indices = @transform_7, window_bounds = array<i64: 1, 8>}, {pipeline_mode = #tpu.pipeline_mode<synchronous>, transform_indices = @transform_8, window_bounds = array<i64: 10, 16>}, {pipeline_mode = #tpu.pipeline_mode<synchronous>, transform_indices = @transform_9, window_bounds = array<i64: 1, 16>}, {pipeline_mode = #tpu.pipeline_mode<synchronous>, transform_indices = @transform_10, window_bounds = array<i64: 8, 96>}, {pipeline_mode = #tpu.pipeline_mode<synchronous>, transform_indices = @transform_11, window_bounds = array<i64: 8, 96>}, {pipeline_mode = #tpu.pipeline_mode<synchronous>, transform_indices = @transform_12, window_bounds = array<i64: 16, 96>}, {pipeline_mode = #tpu.pipeline_mode<synchronous>, transform_indices = @transform_13, window_bounds = array<i64: 1, 96>}, {pipeline_mode = #tpu.pipeline_mode<synchronous>, transform_indices = @transform_14, window_bounds = array<i64: 32, 96>}, {pipeline_mode = #tpu.pipeline_mode<synchronous>, transform_indices = @transform_15, window_bounds = array<i64: 1, 96>}, {pipeline_mode = #tpu.pipeline_mode<synchronous>, transform_indices = @transform_16, window_bounds = array<i64: 10, 32>}, {pipeline_mode = #tpu.pipeline_mode<synchronous>, transform_indices = @transform_17, window_bounds = array<i64: 4, 32>}, {pipeline_mode = #tpu.pipeline_mode<synchronous>, transform_indices = @transform_18, window_bounds = array<i64: 1, 32>}, {pipeline_mode = #tpu.pipeline_mode<synchronous>, transform_indices = @transform_19, window_bounds = array<i64: 32, 64>}, {pipeline_mode = #tpu.pipeline_mode<synchronous>, transform_indices = @transform_20, window_bounds = array<i64: 32, 64>}, {pipeline_mode = #tpu.pipeline_mode<synchronous>, transform_indices = @transform_21, window_bounds = array<i64: 1, 64>}, {pipeline_mode = #tpu.pipeline_mode<synchronous>, transform_indices = @transform_22, window_bounds = array<i64: 64, 64>}, {pipeline_mode = #tpu.pipeline_mode<synchronous>, transform_indices = @transform_23, window_bounds = array<i64: 1, 64>}, {pipeline_mode = #tpu.pipeline_mode<synchronous>, transform_indices = @transform_24, window_bounds = array<i64: 64, 2>}, {pipeline_mode = #tpu.pipeline_mode<synchronous>, transform_indices = @transform_25, window_bounds = array<i64: 1, 2>}, {pipeline_mode = #tpu.pipeline_mode<synchronous>, transform_indices = @transform_26, window_bounds = array<i64: 16, 2>}]} {
    %c0 = arith.constant 0 : index
    %c0_0 = arith.constant 0 : index
    %0 = vector.load %arg1[%c0, %c0_0] : memref<16x4xf32, #tpu.memory_space<vmem>>, vector<16x4xf32>
    %c0_1 = arith.constant 0 : index
    %c0_2 = arith.constant 0 : index
    %1 = vector.load %arg5[%c0_1, %c0_2] : memref<4x8xf32, #tpu.memory_space<vmem>>, vector<4x8xf32>
    %cst = arith.constant dense<0.000000e+00> : vector<16x8xf32>
    %2 = tpu.matmul %0, %1, %cst {dimension_numbers = #tpu.dot_dimension_numbers<[1], [0], [0], [1], [0, 0, 1, 1], [], []>} : vector<16x4xf32>, vector<4x8xf32>, vector<16x8xf32> -> vector<16x8xf32>
    %c0_3 = arith.constant 0 : index
    %c0_4 = arith.constant 0 : index
    %3 = vector.load %arg6[%c0_3, %c0_4] : memref<1x8xf32, #tpu.memory_space<vmem>>, vector<1x8xf32>
    %4 = vector.broadcast %3 : vector<1x8xf32> to vector<16x8xf32>
    %5 = arith.addf %2, %4 : vector<16x8xf32>
    %cst_5 = arith.constant 0.000000e+00 : f32
    %6 = vector.broadcast %cst_5 : f32 to vector<16x8xf32>
    %7 = arith.maximumf %5, %6 : vector<16x8xf32>
    %c0_6 = arith.constant 0 : index
    %c0_7 = arith.constant 0 : index
    %8 = vector.load %arg2[%c0_6, %c0_7] : memref<16x1xf32, #tpu.memory_space<vmem>>, vector<16x1xf32>
    %c0_8 = arith.constant 0 : index
    %c0_9 = arith.constant 0 : index
    %9 = vector.load %arg7[%c0_8, %c0_9] : memref<1x8xf32, #tpu.memory_space<vmem>>, vector<1x8xf32>
    %10 = vector.broadcast %8 : vector<16x1xf32> to vector<16x8xf32>
    %11 = vector.broadcast %9 : vector<1x8xf32> to vector<16x8xf32>
    %12 = arith.mulf %10, %11 : vector<16x8xf32>
    %c0_10 = arith.constant 0 : index
    %c0_11 = arith.constant 0 : index
    %13 = vector.load %arg8[%c0_10, %c0_11] : memref<1x8xf32, #tpu.memory_space<vmem>>, vector<1x8xf32>
    %14 = vector.broadcast %13 : vector<1x8xf32> to vector<16x8xf32>
    %15 = arith.addf %12, %14 : vector<16x8xf32>
    %cst_12 = arith.constant 0.000000e+00 : f32
    %16 = vector.broadcast %cst_12 : f32 to vector<16x8xf32>
    %17 = arith.maximumf %15, %16 : vector<16x8xf32>
    %c0_13 = arith.constant 0 : index
    %c0_14 = arith.constant 0 : index
    %18 = vector.load %arg3[%c0_13, %c0_14] : memref<16x10xf32, #tpu.memory_space<vmem>>, vector<16x10xf32>
    %c0_15 = arith.constant 0 : index
    %c0_16 = arith.constant 0 : index
    %19 = vector.load %arg9[%c0_15, %c0_16] : memref<10x16xf32, #tpu.memory_space<vmem>>, vector<10x16xf32>
    %cst_17 = arith.constant dense<0.000000e+00> : vector<16x16xf32>
    %20 = tpu.matmul %18, %19, %cst_17 {dimension_numbers = #tpu.dot_dimension_numbers<[1], [0], [0], [1], [0, 0, 1, 1], [], []>} : vector<16x10xf32>, vector<10x16xf32>, vector<16x16xf32> -> vector<16x16xf32>
    %c0_18 = arith.constant 0 : index
    %c0_19 = arith.constant 0 : index
    %21 = vector.load %arg10[%c0_18, %c0_19] : memref<1x16xf32, #tpu.memory_space<vmem>>, vector<1x16xf32>
    %22 = vector.broadcast %21 : vector<1x16xf32> to vector<16x16xf32>
    %23 = arith.addf %20, %22 : vector<16x16xf32>
    %cst_20 = arith.constant 0.000000e+00 : f32
    %24 = vector.broadcast %cst_20 : f32 to vector<16x16xf32>
    %25 = arith.maximumf %23, %24 : vector<16x16xf32>
    %c0_21 = arith.constant 0 : index
    %c0_22 = arith.constant 0 : index
    %26 = vector.load %arg11[%c0_21, %c0_22] : memref<8x96xf32, #tpu.memory_space<vmem>>, vector<8x96xf32>
    %cst_23 = arith.constant dense<0.000000e+00> : vector<16x96xf32>
    %27 = tpu.matmul %7, %26, %cst_23 {dimension_numbers = #tpu.dot_dimension_numbers<[1], [0], [0], [1], [0, 0, 1, 1], [], []>} : vector<16x8xf32>, vector<8x96xf32>, vector<16x96xf32> -> vector<16x96xf32>
    %c0_24 = arith.constant 0 : index
    %c0_25 = arith.constant 0 : index
    %28 = vector.load %arg12[%c0_24, %c0_25] : memref<8x96xf32, #tpu.memory_space<vmem>>, vector<8x96xf32>
    %cst_26 = arith.constant dense<0.000000e+00> : vector<16x96xf32>
    %29 = tpu.matmul %17, %28, %cst_26 {dimension_numbers = #tpu.dot_dimension_numbers<[1], [0], [0], [1], [0, 0, 1, 1], [], []>} : vector<16x8xf32>, vector<8x96xf32>, vector<16x96xf32> -> vector<16x96xf32>
    %30 = arith.addf %27, %29 : vector<16x96xf32>
    %c0_27 = arith.constant 0 : index
    %c0_28 = arith.constant 0 : index
    %31 = vector.load %arg13[%c0_27, %c0_28] : memref<16x96xf32, #tpu.memory_space<vmem>>, vector<16x96xf32>
    %cst_29 = arith.constant dense<0.000000e+00> : vector<16x96xf32>
    %32 = tpu.matmul %25, %31, %cst_29 {dimension_numbers = #tpu.dot_dimension_numbers<[1], [0], [0], [1], [0, 0, 1, 1], [], []>} : vector<16x16xf32>, vector<16x96xf32>, vector<16x96xf32> -> vector<16x96xf32>
    %33 = arith.addf %30, %32 : vector<16x96xf32>
    %c0_30 = arith.constant 0 : index
    %c0_31 = arith.constant 0 : index
    %34 = vector.load %arg14[%c0_30, %c0_31] : memref<1x96xf32, #tpu.memory_space<vmem>>, vector<1x96xf32>
    %35 = vector.broadcast %34 : vector<1x96xf32> to vector<16x96xf32>
    %36 = arith.addf %33, %35 : vector<16x96xf32>
    %c0_32 = arith.constant 0 : index
    %c0_33 = arith.constant 0 : index
    %37 = vector.load %arg15[%c0_32, %c0_33] : memref<32x96xf32, #tpu.memory_space<vmem>>, vector<32x96xf32>
    %c0_34 = arith.constant 0 : index
    %c0_35 = arith.constant 0 : index
    %38 = vector.load %arg16[%c0_34, %c0_35] : memref<1x96xf32, #tpu.memory_space<vmem>>, vector<1x96xf32>
    %cst_36 = arith.constant 0.000000e+00 : f32
    %39 = vector.broadcast %cst_36 : f32 to vector<2x32xf32>
    %40 = vector.extract_strided_slice %36 {offsets = [0, 0], sizes = [2, 96], strides = [1, 1]} : vector<16x96xf32> to vector<2x96xf32>
    %cst_37 = arith.constant dense<0.000000e+00> : vector<2x96xf32>
    %41 = tpu.matmul %39, %37, %cst_37 {dimension_numbers = #tpu.dot_dimension_numbers<[1], [0], [0], [1], [0, 0, 1, 1], [], []>} : vector<2x32xf32>, vector<32x96xf32>, vector<2x96xf32> -> vector<2x96xf32>
    %42 = vector.broadcast %38 : vector<1x96xf32> to vector<2x96xf32>
    %43 = arith.addf %41, %42 : vector<2x96xf32>
    %44 = vector.extract_strided_slice %40 {offsets = [0, 0], sizes = [2, 32], strides = [1, 1]} : vector<2x96xf32> to vector<2x32xf32>
    %45 = vector.extract_strided_slice %40 {offsets = [0, 32], sizes = [2, 32], strides = [1, 1]} : vector<2x96xf32> to vector<2x32xf32>
    %46 = vector.extract_strided_slice %40 {offsets = [0, 64], sizes = [2, 32], strides = [1, 1]} : vector<2x96xf32> to vector<2x32xf32>
    %47 = vector.extract_strided_slice %43 {offsets = [0, 0], sizes = [2, 32], strides = [1, 1]} : vector<2x96xf32> to vector<2x32xf32>
    %48 = vector.extract_strided_slice %43 {offsets = [0, 32], sizes = [2, 32], strides = [1, 1]} : vector<2x96xf32> to vector<2x32xf32>
    %49 = vector.extract_strided_slice %43 {offsets = [0, 64], sizes = [2, 32], strides = [1, 1]} : vector<2x96xf32> to vector<2x32xf32>
    %50 = arith.addf %44, %47 : vector<2x32xf32>
    %51 = arith.negf %50 : vector<2x32xf32>
    %52 = math.exp %51 : vector<2x32xf32>
    %cst_38 = arith.constant 1.000000e+00 : f32
    %53 = vector.broadcast %cst_38 : f32 to vector<2x32xf32>
    %54 = arith.addf %53, %52 : vector<2x32xf32>
    %55 = arith.divf %53, %54 : vector<2x32xf32>
    %56 = arith.addf %45, %48 : vector<2x32xf32>
    %57 = arith.negf %56 : vector<2x32xf32>
    %58 = math.exp %57 : vector<2x32xf32>
    %cst_39 = arith.constant 1.000000e+00 : f32
    %59 = vector.broadcast %cst_39 : f32 to vector<2x32xf32>
    %60 = arith.addf %59, %58 : vector<2x32xf32>
    %61 = arith.divf %59, %60 : vector<2x32xf32>
    %62 = arith.mulf %55, %49 : vector<2x32xf32>
    %63 = arith.addf %46, %62 : vector<2x32xf32>
    %64 = math.tanh %63 : vector<2x32xf32>
    %cst_40 = arith.constant 1.000000e+00 : f32
    %65 = vector.broadcast %cst_40 : f32 to vector<2x32xf32>
    %66 = arith.subf %65, %61 : vector<2x32xf32>
    %67 = arith.mulf %66, %64 : vector<2x32xf32>
    %68 = arith.mulf %61, %39 : vector<2x32xf32>
    %69 = arith.addf %67, %68 : vector<2x32xf32>
    %c0_41 = arith.constant 0 : index
    %c0_42 = arith.constant 0 : index
    %70 = vector.load %arg28[%c0_41, %c0_42] : memref<16x32xf32, #tpu.memory_space<vmem>>, vector<2x32xf32>
    tpu.vector_store %arg28[%c0_41, %c0_42], %69 {strides = array<i32>} : memref<16x32xf32, #tpu.memory_space<vmem>>, vector<2x32xf32>,
    %71 = vector.extract_strided_slice %36 {offsets = [2, 0], sizes = [2, 96], strides = [1, 1]} : vector<16x96xf32> to vector<2x96xf32>
    %cst_43 = arith.constant dense<0.000000e+00> : vector<2x96xf32>
    %72 = tpu.matmul %69, %37, %cst_43 {dimension_numbers = #tpu.dot_dimension_numbers<[1], [0], [0], [1], [0, 0, 1, 1], [], []>} : vector<2x32xf32>, vector<32x96xf32>, vector<2x96xf32> -> vector<2x96xf32>
    %73 = vector.broadcast %38 : vector<1x96xf32> to vector<2x96xf32>
    %74 = arith.addf %72, %73 : vector<2x96xf32>
    %75 = vector.extract_strided_slice %71 {offsets = [0, 0], sizes = [2, 32], strides = [1, 1]} : vector<2x96xf32> to vector<2x32xf32>
    %76 = vector.extract_strided_slice %71 {offsets = [0, 32], sizes = [2, 32], strides = [1, 1]} : vector<2x96xf32> to vector<2x32xf32>
    %77 = vector.extract_strided_slice %71 {offsets = [0, 64], sizes = [2, 32], strides = [1, 1]} : vector<2x96xf32> to vector<2x32xf32>
    %78 = vector.extract_strided_slice %74 {offsets = [0, 0], sizes = [2, 32], strides = [1, 1]} : vector<2x96xf32> to vector<2x32xf32>
    %79 = vector.extract_strided_slice %74 {offsets = [0, 32], sizes = [2, 32], strides = [1, 1]} : vector<2x96xf32> to vector<2x32xf32>
    %80 = vector.extract_strided_slice %74 {offsets = [0, 64], sizes = [2, 32], strides = [1, 1]} : vector<2x96xf32> to vector<2x32xf32>
    %81 = arith.addf %75, %78 : vector<2x32xf32>
    %82 = arith.negf %81 : vector<2x32xf32>
    %83 = math.exp %82 : vector<2x32xf32>
    %cst_44 = arith.constant 1.000000e+00 : f32
    %84 = vector.broadcast %cst_44 : f32 to vector<2x32xf32>
    %85 = arith.addf %84, %83 : vector<2x32xf32>
    %86 = arith.divf %84, %85 : vector<2x32xf32>
    %87 = arith.addf %76, %79 : vector<2x32xf32>
    %88 = arith.negf %87 : vector<2x32xf32>
    %89 = math.exp %88 : vector<2x32xf32>
    %cst_45 = arith.constant 1.000000e+00 : f32
    %90 = vector.broadcast %cst_45 : f32 to vector<2x32xf32>
    %91 = arith.addf %90, %89 : vector<2x32xf32>
    %92 = arith.divf %90, %91 : vector<2x32xf32>
    %93 = arith.mulf %86, %80 : vector<2x32xf32>
    %94 = arith.addf %77, %93 : vector<2x32xf32>
    %95 = math.tanh %94 : vector<2x32xf32>
    %cst_46 = arith.constant 1.000000e+00 : f32
    %96 = vector.broadcast %cst_46 : f32 to vector<2x32xf32>
    %97 = arith.subf %96, %92 : vector<2x32xf32>
    %98 = arith.mulf %97, %95 : vector<2x32xf32>
    %99 = arith.mulf %92, %69 : vector<2x32xf32>
    %100 = arith.addf %98, %99 : vector<2x32xf32>
    %c2 = arith.constant 2 : index
    %c0_47 = arith.constant 0 : index
    %101 = vector.load %arg28[%c2, %c0_47] : memref<16x32xf32, #tpu.memory_space<vmem>>, vector<2x32xf32>
    tpu.vector_store %arg28[%c2, %c0_47], %100 {strides = array<i32>} : memref<16x32xf32, #tpu.memory_space<vmem>>, vector<2x32xf32>,
    %102 = vector.extract_strided_slice %36 {offsets = [4, 0], sizes = [2, 96], strides = [1, 1]} : vector<16x96xf32> to vector<2x96xf32>
    %cst_48 = arith.constant dense<0.000000e+00> : vector<2x96xf32>
    %103 = tpu.matmul %100, %37, %cst_48 {dimension_numbers = #tpu.dot_dimension_numbers<[1], [0], [0], [1], [0, 0, 1, 1], [], []>} : vector<2x32xf32>, vector<32x96xf32>, vector<2x96xf32> -> vector<2x96xf32>
    %104 = vector.broadcast %38 : vector<1x96xf32> to vector<2x96xf32>
    %105 = arith.addf %103, %104 : vector<2x96xf32>
    %106 = vector.extract_strided_slice %102 {offsets = [0, 0], sizes = [2, 32], strides = [1, 1]} : vector<2x96xf32> to vector<2x32xf32>
    %107 = vector.extract_strided_slice %102 {offsets = [0, 32], sizes = [2, 32], strides = [1, 1]} : vector<2x96xf32> to vector<2x32xf32>
    %108 = vector.extract_strided_slice %102 {offsets = [0, 64], sizes = [2, 32], strides = [1, 1]} : vector<2x96xf32> to vector<2x32xf32>
    %109 = vector.extract_strided_slice %105 {offsets = [0, 0], sizes = [2, 32], strides = [1, 1]} : vector<2x96xf32> to vector<2x32xf32>
    %110 = vector.extract_strided_slice %105 {offsets = [0, 32], sizes = [2, 32], strides = [1, 1]} : vector<2x96xf32> to vector<2x32xf32>
    %111 = vector.extract_strided_slice %105 {offsets = [0, 64], sizes = [2, 32], strides = [1, 1]} : vector<2x96xf32> to vector<2x32xf32>
    %112 = arith.addf %106, %109 : vector<2x32xf32>
    %113 = arith.negf %112 : vector<2x32xf32>
    %114 = math.exp %113 : vector<2x32xf32>
    %cst_49 = arith.constant 1.000000e+00 : f32
    %115 = vector.broadcast %cst_49 : f32 to vector<2x32xf32>
    %116 = arith.addf %115, %114 : vector<2x32xf32>
    %117 = arith.divf %115, %116 : vector<2x32xf32>
    %118 = arith.addf %107, %110 : vector<2x32xf32>
    %119 = arith.negf %118 : vector<2x32xf32>
    %120 = math.exp %119 : vector<2x32xf32>
    %cst_50 = arith.constant 1.000000e+00 : f32
    %121 = vector.broadcast %cst_50 : f32 to vector<2x32xf32>
    %122 = arith.addf %121, %120 : vector<2x32xf32>
    %123 = arith.divf %121, %122 : vector<2x32xf32>
    %124 = arith.mulf %117, %111 : vector<2x32xf32>
    %125 = arith.addf %108, %124 : vector<2x32xf32>
    %126 = math.tanh %125 : vector<2x32xf32>
    %cst_51 = arith.constant 1.000000e+00 : f32
    %127 = vector.broadcast %cst_51 : f32 to vector<2x32xf32>
    %128 = arith.subf %127, %123 : vector<2x32xf32>
    %129 = arith.mulf %128, %126 : vector<2x32xf32>
    %130 = arith.mulf %123, %100 : vector<2x32xf32>
    %131 = arith.addf %129, %130 : vector<2x32xf32>
    %c4 = arith.constant 4 : index
    %c0_52 = arith.constant 0 : index
    %132 = vector.load %arg28[%c4, %c0_52] : memref<16x32xf32, #tpu.memory_space<vmem>>, vector<2x32xf32>
    tpu.vector_store %arg28[%c4, %c0_52], %131 {strides = array<i32>} : memref<16x32xf32, #tpu.memory_space<vmem>>, vector<2x32xf32>,
    %133 = vector.extract_strided_slice %36 {offsets = [6, 0], sizes = [2, 96], strides = [1, 1]} : vector<16x96xf32> to vector<2x96xf32>
    %cst_53 = arith.constant dense<0.000000e+00> : vector<2x96xf32>
    %134 = tpu.matmul %131, %37, %cst_53 {dimension_numbers = #tpu.dot_dimension_numbers<[1], [0], [0], [1], [0, 0, 1, 1], [], []>} : vector<2x32xf32>, vector<32x96xf32>, vector<2x96xf32> -> vector<2x96xf32>
    %135 = vector.broadcast %38 : vector<1x96xf32> to vector<2x96xf32>
    %136 = arith.addf %134, %135 : vector<2x96xf32>
    %137 = vector.extract_strided_slice %133 {offsets = [0, 0], sizes = [2, 32], strides = [1, 1]} : vector<2x96xf32> to vector<2x32xf32>
    %138 = vector.extract_strided_slice %133 {offsets = [0, 32], sizes = [2, 32], strides = [1, 1]} : vector<2x96xf32> to vector<2x32xf32>
    %139 = vector.extract_strided_slice %133 {offsets = [0, 64], sizes = [2, 32], strides = [1, 1]} : vector<2x96xf32> to vector<2x32xf32>
    %140 = vector.extract_strided_slice %136 {offsets = [0, 0], sizes = [2, 32], strides = [1, 1]} : vector<2x96xf32> to vector<2x32xf32>
    %141 = vector.extract_strided_slice %136 {offsets = [0, 32], sizes = [2, 32], strides = [1, 1]} : vector<2x96xf32> to vector<2x32xf32>
    %142 = vector.extract_strided_slice %136 {offsets = [0, 64], sizes = [2, 32], strides = [1, 1]} : vector<2x96xf32> to vector<2x32xf32>
    %143 = arith.addf %137, %140 : vector<2x32xf32>
    %144 = arith.negf %143 : vector<2x32xf32>
    %145 = math.exp %144 : vector<2x32xf32>
    %cst_54 = arith.constant 1.000000e+00 : f32
    %146 = vector.broadcast %cst_54 : f32 to vector<2x32xf32>
    %147 = arith.addf %146, %145 : vector<2x32xf32>
    %148 = arith.divf %146, %147 : vector<2x32xf32>
    %149 = arith.addf %138, %141 : vector<2x32xf32>
    %150 = arith.negf %149 : vector<2x32xf32>
    %151 = math.exp %150 : vector<2x32xf32>
    %cst_55 = arith.constant 1.000000e+00 : f32
    %152 = vector.broadcast %cst_55 : f32 to vector<2x32xf32>
    %153 = arith.addf %152, %151 : vector<2x32xf32>
    %154 = arith.divf %152, %153 : vector<2x32xf32>
    %155 = arith.mulf %148, %142 : vector<2x32xf32>
    %156 = arith.addf %139, %155 : vector<2x32xf32>
    %157 = math.tanh %156 : vector<2x32xf32>
    %cst_56 = arith.constant 1.000000e+00 : f32
    %158 = vector.broadcast %cst_56 : f32 to vector<2x32xf32>
    %159 = arith.subf %158, %154 : vector<2x32xf32>
    %160 = arith.mulf %159, %157 : vector<2x32xf32>
    %161 = arith.mulf %154, %131 : vector<2x32xf32>
    %162 = arith.addf %160, %161 : vector<2x32xf32>
    %c6 = arith.constant 6 : index
    %c0_57 = arith.constant 0 : index
    %163 = vector.load %arg28[%c6, %c0_57] : memref<16x32xf32, #tpu.memory_space<vmem>>, vector<2x32xf32>
    tpu.vector_store %arg28[%c6, %c0_57], %162 {strides = array<i32>} : memref<16x32xf32, #tpu.memory_space<vmem>>, vector<2x32xf32>,
    %164 = vector.extract_strided_slice %36 {offsets = [8, 0], sizes = [2, 96], strides = [1, 1]} : vector<16x96xf32> to vector<2x96xf32>
    %cst_58 = arith.constant dense<0.000000e+00> : vector<2x96xf32>
    %165 = tpu.matmul %162, %37, %cst_58 {dimension_numbers = #tpu.dot_dimension_numbers<[1], [0], [0], [1], [0, 0, 1, 1], [], []>} : vector<2x32xf32>, vector<32x96xf32>, vector<2x96xf32> -> vector<2x96xf32>
    %166 = vector.broadcast %38 : vector<1x96xf32> to vector<2x96xf32>
    %167 = arith.addf %165, %166 : vector<2x96xf32>
    %168 = vector.extract_strided_slice %164 {offsets = [0, 0], sizes = [2, 32], strides = [1, 1]} : vector<2x96xf32> to vector<2x32xf32>
    %169 = vector.extract_strided_slice %164 {offsets = [0, 32], sizes = [2, 32], strides = [1, 1]} : vector<2x96xf32> to vector<2x32xf32>
    %170 = vector.extract_strided_slice %164 {offsets = [0, 64], sizes = [2, 32], strides = [1, 1]} : vector<2x96xf32> to vector<2x32xf32>
    %171 = vector.extract_strided_slice %167 {offsets = [0, 0], sizes = [2, 32], strides = [1, 1]} : vector<2x96xf32> to vector<2x32xf32>
    %172 = vector.extract_strided_slice %167 {offsets = [0, 32], sizes = [2, 32], strides = [1, 1]} : vector<2x96xf32> to vector<2x32xf32>
    %173 = vector.extract_strided_slice %167 {offsets = [0, 64], sizes = [2, 32], strides = [1, 1]} : vector<2x96xf32> to vector<2x32xf32>
    %174 = arith.addf %168, %171 : vector<2x32xf32>
    %175 = arith.negf %174 : vector<2x32xf32>
    %176 = math.exp %175 : vector<2x32xf32>
    %cst_59 = arith.constant 1.000000e+00 : f32
    %177 = vector.broadcast %cst_59 : f32 to vector<2x32xf32>
    %178 = arith.addf %177, %176 : vector<2x32xf32>
    %179 = arith.divf %177, %178 : vector<2x32xf32>
    %180 = arith.addf %169, %172 : vector<2x32xf32>
    %181 = arith.negf %180 : vector<2x32xf32>
    %182 = math.exp %181 : vector<2x32xf32>
    %cst_60 = arith.constant 1.000000e+00 : f32
    %183 = vector.broadcast %cst_60 : f32 to vector<2x32xf32>
    %184 = arith.addf %183, %182 : vector<2x32xf32>
    %185 = arith.divf %183, %184 : vector<2x32xf32>
    %186 = arith.mulf %179, %173 : vector<2x32xf32>
    %187 = arith.addf %170, %186 : vector<2x32xf32>
    %188 = math.tanh %187 : vector<2x32xf32>
    %cst_61 = arith.constant 1.000000e+00 : f32
    %189 = vector.broadcast %cst_61 : f32 to vector<2x32xf32>
    %190 = arith.subf %189, %185 : vector<2x32xf32>
    %191 = arith.mulf %190, %188 : vector<2x32xf32>
    %192 = arith.mulf %185, %162 : vector<2x32xf32>
    %193 = arith.addf %191, %192 : vector<2x32xf32>
    %c8 = arith.constant 8 : index
    %c0_62 = arith.constant 0 : index
    %194 = vector.load %arg28[%c8, %c0_62] : memref<16x32xf32, #tpu.memory_space<vmem>>, vector<2x32xf32>
    tpu.vector_store %arg28[%c8, %c0_62], %193 {strides = array<i32>} : memref<16x32xf32, #tpu.memory_space<vmem>>, vector<2x32xf32>,
    %195 = vector.extract_strided_slice %36 {offsets = [10, 0], sizes = [2, 96], strides = [1, 1]} : vector<16x96xf32> to vector<2x96xf32>
    %cst_63 = arith.constant dense<0.000000e+00> : vector<2x96xf32>
    %196 = tpu.matmul %193, %37, %cst_63 {dimension_numbers = #tpu.dot_dimension_numbers<[1], [0], [0], [1], [0, 0, 1, 1], [], []>} : vector<2x32xf32>, vector<32x96xf32>, vector<2x96xf32> -> vector<2x96xf32>
    %197 = vector.broadcast %38 : vector<1x96xf32> to vector<2x96xf32>
    %198 = arith.addf %196, %197 : vector<2x96xf32>
    %199 = vector.extract_strided_slice %195 {offsets = [0, 0], sizes = [2, 32], strides = [1, 1]} : vector<2x96xf32> to vector<2x32xf32>
    %200 = vector.extract_strided_slice %195 {offsets = [0, 32], sizes = [2, 32], strides = [1, 1]} : vector<2x96xf32> to vector<2x32xf32>
    %201 = vector.extract_strided_slice %195 {offsets = [0, 64], sizes = [2, 32], strides = [1, 1]} : vector<2x96xf32> to vector<2x32xf32>
    %202 = vector.extract_strided_slice %198 {offsets = [0, 0], sizes = [2, 32], strides = [1, 1]} : vector<2x96xf32> to vector<2x32xf32>
    %203 = vector.extract_strided_slice %198 {offsets = [0, 32], sizes = [2, 32], strides = [1, 1]} : vector<2x96xf32> to vector<2x32xf32>
    %204 = vector.extract_strided_slice %198 {offsets = [0, 64], sizes = [2, 32], strides = [1, 1]} : vector<2x96xf32> to vector<2x32xf32>
    %205 = arith.addf %199, %202 : vector<2x32xf32>
    %206 = arith.negf %205 : vector<2x32xf32>
    %207 = math.exp %206 : vector<2x32xf32>
    %cst_64 = arith.constant 1.000000e+00 : f32
    %208 = vector.broadcast %cst_64 : f32 to vector<2x32xf32>
    %209 = arith.addf %208, %207 : vector<2x32xf32>
    %210 = arith.divf %208, %209 : vector<2x32xf32>
    %211 = arith.addf %200, %203 : vector<2x32xf32>
    %212 = arith.negf %211 : vector<2x32xf32>
    %213 = math.exp %212 : vector<2x32xf32>
    %cst_65 = arith.constant 1.000000e+00 : f32
    %214 = vector.broadcast %cst_65 : f32 to vector<2x32xf32>
    %215 = arith.addf %214, %213 : vector<2x32xf32>
    %216 = arith.divf %214, %215 : vector<2x32xf32>
    %217 = arith.mulf %210, %204 : vector<2x32xf32>
    %218 = arith.addf %201, %217 : vector<2x32xf32>
    %219 = math.tanh %218 : vector<2x32xf32>
    %cst_66 = arith.constant 1.000000e+00 : f32
    %220 = vector.broadcast %cst_66 : f32 to vector<2x32xf32>
    %221 = arith.subf %220, %216 : vector<2x32xf32>
    %222 = arith.mulf %221, %219 : vector<2x32xf32>
    %223 = arith.mulf %216, %193 : vector<2x32xf32>
    %224 = arith.addf %222, %223 : vector<2x32xf32>
    %c10 = arith.constant 10 : index
    %c0_67 = arith.constant 0 : index
    %225 = vector.load %arg28[%c10, %c0_67] : memref<16x32xf32, #tpu.memory_space<vmem>>, vector<2x32xf32>
    tpu.vector_store %arg28[%c10, %c0_67], %224 {strides = array<i32>} : memref<16x32xf32, #tpu.memory_space<vmem>>, vector<2x32xf32>,
    %226 = vector.extract_strided_slice %36 {offsets = [12, 0], sizes = [2, 96], strides = [1, 1]} : vector<16x96xf32> to vector<2x96xf32>
    %cst_68 = arith.constant dense<0.000000e+00> : vector<2x96xf32>
    %227 = tpu.matmul %224, %37, %cst_68 {dimension_numbers = #tpu.dot_dimension_numbers<[1], [0], [0], [1], [0, 0, 1, 1], [], []>} : vector<2x32xf32>, vector<32x96xf32>, vector<2x96xf32> -> vector<2x96xf32>
    %228 = vector.broadcast %38 : vector<1x96xf32> to vector<2x96xf32>
    %229 = arith.addf %227, %228 : vector<2x96xf32>
    %230 = vector.extract_strided_slice %226 {offsets = [0, 0], sizes = [2, 32], strides = [1, 1]} : vector<2x96xf32> to vector<2x32xf32>
    %231 = vector.extract_strided_slice %226 {offsets = [0, 32], sizes = [2, 32], strides = [1, 1]} : vector<2x96xf32> to vector<2x32xf32>
    %232 = vector.extract_strided_slice %226 {offsets = [0, 64], sizes = [2, 32], strides = [1, 1]} : vector<2x96xf32> to vector<2x32xf32>
    %233 = vector.extract_strided_slice %229 {offsets = [0, 0], sizes = [2, 32], strides = [1, 1]} : vector<2x96xf32> to vector<2x32xf32>
    %234 = vector.extract_strided_slice %229 {offsets = [0, 32], sizes = [2, 32], strides = [1, 1]} : vector<2x96xf32> to vector<2x32xf32>
    %235 = vector.extract_strided_slice %229 {offsets = [0, 64], sizes = [2, 32], strides = [1, 1]} : vector<2x96xf32> to vector<2x32xf32>
    %236 = arith.addf %230, %233 : vector<2x32xf32>
    %237 = arith.negf %236 : vector<2x32xf32>
    %238 = math.exp %237 : vector<2x32xf32>
    %cst_69 = arith.constant 1.000000e+00 : f32
    %239 = vector.broadcast %cst_69 : f32 to vector<2x32xf32>
    %240 = arith.addf %239, %238 : vector<2x32xf32>
    %241 = arith.divf %239, %240 : vector<2x32xf32>
    %242 = arith.addf %231, %234 : vector<2x32xf32>
    %243 = arith.negf %242 : vector<2x32xf32>
    %244 = math.exp %243 : vector<2x32xf32>
    %cst_70 = arith.constant 1.000000e+00 : f32
    %245 = vector.broadcast %cst_70 : f32 to vector<2x32xf32>
    %246 = arith.addf %245, %244 : vector<2x32xf32>
    %247 = arith.divf %245, %246 : vector<2x32xf32>
    %248 = arith.mulf %241, %235 : vector<2x32xf32>
    %249 = arith.addf %232, %248 : vector<2x32xf32>
    %250 = math.tanh %249 : vector<2x32xf32>
    %cst_71 = arith.constant 1.000000e+00 : f32
    %251 = vector.broadcast %cst_71 : f32 to vector<2x32xf32>
    %252 = arith.subf %251, %247 : vector<2x32xf32>
    %253 = arith.mulf %252, %250 : vector<2x32xf32>
    %254 = arith.mulf %247, %224 : vector<2x32xf32>
    %255 = arith.addf %253, %254 : vector<2x32xf32>
    %c12 = arith.constant 12 : index
    %c0_72 = arith.constant 0 : index
    %256 = vector.load %arg28[%c12, %c0_72] : memref<16x32xf32, #tpu.memory_space<vmem>>, vector<2x32xf32>
    tpu.vector_store %arg28[%c12, %c0_72], %255 {strides = array<i32>} : memref<16x32xf32, #tpu.memory_space<vmem>>, vector<2x32xf32>,
    %257 = vector.extract_strided_slice %36 {offsets = [14, 0], sizes = [2, 96], strides = [1, 1]} : vector<16x96xf32> to vector<2x96xf32>
    %cst_73 = arith.constant dense<0.000000e+00> : vector<2x96xf32>
    %258 = tpu.matmul %255, %37, %cst_73 {dimension_numbers = #tpu.dot_dimension_numbers<[1], [0], [0], [1], [0, 0, 1, 1], [], []>} : vector<2x32xf32>, vector<32x96xf32>, vector<2x96xf32> -> vector<2x96xf32>
    %259 = vector.broadcast %38 : vector<1x96xf32> to vector<2x96xf32>
    %260 = arith.addf %258, %259 : vector<2x96xf32>
    %261 = vector.extract_strided_slice %257 {offsets = [0, 0], sizes = [2, 32], strides = [1, 1]} : vector<2x96xf32> to vector<2x32xf32>
    %262 = vector.extract_strided_slice %257 {offsets = [0, 32], sizes = [2, 32], strides = [1, 1]} : vector<2x96xf32> to vector<2x32xf32>
    %263 = vector.extract_strided_slice %257 {offsets = [0, 64], sizes = [2, 32], strides = [1, 1]} : vector<2x96xf32> to vector<2x32xf32>
    %264 = vector.extract_strided_slice %260 {offsets = [0, 0], sizes = [2, 32], strides = [1, 1]} : vector<2x96xf32> to vector<2x32xf32>
    %265 = vector.extract_strided_slice %260 {offsets = [0, 32], sizes = [2, 32], strides = [1, 1]} : vector<2x96xf32> to vector<2x32xf32>
    %266 = vector.extract_strided_slice %260 {offsets = [0, 64], sizes = [2, 32], strides = [1, 1]} : vector<2x96xf32> to vector<2x32xf32>
    %267 = arith.addf %261, %264 : vector<2x32xf32>
    %268 = arith.negf %267 : vector<2x32xf32>
    %269 = math.exp %268 : vector<2x32xf32>
    %cst_74 = arith.constant 1.000000e+00 : f32
    %270 = vector.broadcast %cst_74 : f32 to vector<2x32xf32>
    %271 = arith.addf %270, %269 : vector<2x32xf32>
    %272 = arith.divf %270, %271 : vector<2x32xf32>
    %273 = arith.addf %262, %265 : vector<2x32xf32>
    %274 = arith.negf %273 : vector<2x32xf32>
    %275 = math.exp %274 : vector<2x32xf32>
    %cst_75 = arith.constant 1.000000e+00 : f32
    %276 = vector.broadcast %cst_75 : f32 to vector<2x32xf32>
    %277 = arith.addf %276, %275 : vector<2x32xf32>
    %278 = arith.divf %276, %277 : vector<2x32xf32>
    %279 = arith.mulf %272, %266 : vector<2x32xf32>
    %280 = arith.addf %263, %279 : vector<2x32xf32>
    %281 = math.tanh %280 : vector<2x32xf32>
    %cst_76 = arith.constant 1.000000e+00 : f32
    %282 = vector.broadcast %cst_76 : f32 to vector<2x32xf32>
    %283 = arith.subf %282, %278 : vector<2x32xf32>
    %284 = arith.mulf %283, %281 : vector<2x32xf32>
    %285 = arith.mulf %278, %255 : vector<2x32xf32>
    %286 = arith.addf %284, %285 : vector<2x32xf32>
    %c14 = arith.constant 14 : index
    %c0_77 = arith.constant 0 : index
    %287 = vector.load %arg28[%c14, %c0_77] : memref<16x32xf32, #tpu.memory_space<vmem>>, vector<2x32xf32>
    tpu.vector_store %arg28[%c14, %c0_77], %286 {strides = array<i32>} : memref<16x32xf32, #tpu.memory_space<vmem>>, vector<2x32xf32>,
    %c0_78 = arith.constant 0 : index
    %c0_79 = arith.constant 0 : index
    %288 = vector.load %arg3[%c0_78, %c0_79] : memref<16x10xf32, #tpu.memory_space<vmem>>, vector<16x10xf32>
    %c0_80 = arith.constant 0 : index
    %c0_81 = arith.constant 0 : index
    %289 = vector.load %arg17[%c0_80, %c0_81] : memref<10x32xf32, #tpu.memory_space<vmem>>, vector<10x32xf32>
    %cst_82 = arith.constant dense<0.000000e+00> : vector<16x32xf32>
    %290 = tpu.matmul %288, %289, %cst_82 {dimension_numbers = #tpu.dot_dimension_numbers<[1], [0], [0], [1], [0, 0, 1, 1], [], []>} : vector<16x10xf32>, vector<10x32xf32>, vector<16x32xf32> -> vector<16x32xf32>
    %c0_83 = arith.constant 0 : index
    %c0_84 = arith.constant 0 : index
    %291 = vector.load %arg4[%c0_83, %c0_84] : memref<16x4xf32, #tpu.memory_space<vmem>>, vector<16x4xf32>
    %c0_85 = arith.constant 0 : index
    %c0_86 = arith.constant 0 : index
    %292 = vector.load %arg18[%c0_85, %c0_86] : memref<4x32xf32, #tpu.memory_space<vmem>>, vector<4x32xf32>
    %cst_87 = arith.constant dense<0.000000e+00> : vector<16x32xf32>
    %293 = tpu.matmul %291, %292, %cst_87 {dimension_numbers = #tpu.dot_dimension_numbers<[1], [0], [0], [1], [0, 0, 1, 1], [], []>} : vector<16x4xf32>, vector<4x32xf32>, vector<16x32xf32> -> vector<16x32xf32>
    %294 = arith.addf %290, %293 : vector<16x32xf32>
    %c0_88 = arith.constant 0 : index
    %c0_89 = arith.constant 0 : index
    %295 = vector.load %arg19[%c0_88, %c0_89] : memref<1x32xf32, #tpu.memory_space<vmem>>, vector<1x32xf32>
    %296 = vector.broadcast %295 : vector<1x32xf32> to vector<16x32xf32>
    %297 = arith.addf %294, %296 : vector<16x32xf32>
    %cst_90 = arith.constant 0.000000e+00 : f32
    %298 = vector.broadcast %cst_90 : f32 to vector<16x32xf32>
    %299 = arith.maximumf %297, %298 : vector<16x32xf32>
    %c0_91 = arith.constant 0 : index
    %c0_92 = arith.constant 0 : index
    %300 = vector.load %arg28[%c0_91, %c0_92] : memref<16x32xf32, #tpu.memory_space<vmem>>, vector<16x32xf32>
    %c0_93 = arith.constant 0 : index
    %c0_94 = arith.constant 0 : index
    %301 = vector.load %arg20[%c0_93, %c0_94] : memref<32x64xf32, #tpu.memory_space<vmem>>, vector<32x64xf32>
    %cst_95 = arith.constant dense<0.000000e+00> : vector<16x64xf32>
    %302 = tpu.matmul %300, %301, %cst_95 {dimension_numbers = #tpu.dot_dimension_numbers<[1], [0], [0], [1], [0, 0, 1, 1], [], []>} : vector<16x32xf32>, vector<32x64xf32>, vector<16x64xf32> -> vector<16x64xf32>
    %c0_96 = arith.constant 0 : index
    %c0_97 = arith.constant 0 : index
    %303 = vector.load %arg21[%c0_96, %c0_97] : memref<32x64xf32, #tpu.memory_space<vmem>>, vector<32x64xf32>
    %cst_98 = arith.constant dense<0.000000e+00> : vector<16x64xf32>
    %304 = tpu.matmul %299, %303, %cst_98 {dimension_numbers = #tpu.dot_dimension_numbers<[1], [0], [0], [1], [0, 0, 1, 1], [], []>} : vector<16x32xf32>, vector<32x64xf32>, vector<16x64xf32> -> vector<16x64xf32>
    %305 = arith.addf %302, %304 : vector<16x64xf32>
    %c0_99 = arith.constant 0 : index
    %c0_100 = arith.constant 0 : index
    %306 = vector.load %arg22[%c0_99, %c0_100] : memref<1x64xf32, #tpu.memory_space<vmem>>, vector<1x64xf32>
    %307 = vector.broadcast %306 : vector<1x64xf32> to vector<16x64xf32>
    %308 = arith.addf %305, %307 : vector<16x64xf32>
    %cst_101 = arith.constant 0.000000e+00 : f32
    %309 = vector.broadcast %cst_101 : f32 to vector<16x64xf32>
    %310 = arith.maximumf %308, %309 : vector<16x64xf32>
    %c0_102 = arith.constant 0 : index
    %c0_103 = arith.constant 0 : index
    %311 = vector.load %arg23[%c0_102, %c0_103] : memref<64x64xf32, #tpu.memory_space<vmem>>, vector<64x64xf32>
    %cst_104 = arith.constant dense<0.000000e+00> : vector<16x64xf32>
    %312 = tpu.matmul %310, %311, %cst_104 {dimension_numbers = #tpu.dot_dimension_numbers<[1], [0], [0], [1], [0, 0, 1, 1], [], []>} : vector<16x64xf32>, vector<64x64xf32>, vector<16x64xf32> -> vector<16x64xf32>
    %c0_105 = arith.constant 0 : index
    %c0_106 = arith.constant 0 : index
    %313 = vector.load %arg24[%c0_105, %c0_106] : memref<1x64xf32, #tpu.memory_space<vmem>>, vector<1x64xf32>
    %314 = vector.broadcast %313 : vector<1x64xf32> to vector<16x64xf32>
    %315 = arith.addf %312, %314 : vector<16x64xf32>
    %cst_107 = arith.constant 0.000000e+00 : f32
    %316 = vector.broadcast %cst_107 : f32 to vector<16x64xf32>
    %317 = arith.maximumf %315, %316 : vector<16x64xf32>
    %c0_108 = arith.constant 0 : index
    %c0_109 = arith.constant 0 : index
    %318 = vector.load %arg25[%c0_108, %c0_109] : memref<64x2xf32, #tpu.memory_space<vmem>>, vector<64x2xf32>
    %cst_110 = arith.constant dense<0.000000e+00> : vector<16x2xf32>
    %319 = tpu.matmul %317, %318, %cst_110 {dimension_numbers = #tpu.dot_dimension_numbers<[1], [0], [0], [1], [0, 0, 1, 1], [], []>} : vector<16x64xf32>, vector<64x2xf32>, vector<16x2xf32> -> vector<16x2xf32>
    %c0_111 = arith.constant 0 : index
    %c0_112 = arith.constant 0 : index
    %320 = vector.load %arg26[%c0_111, %c0_112] : memref<1x2xf32, #tpu.memory_space<vmem>>, vector<1x2xf32>
    %321 = vector.broadcast %320 : vector<1x2xf32> to vector<16x2xf32>
    %322 = arith.addf %319, %321 : vector<16x2xf32>
    %c0_113 = arith.constant 0 : index
    %c0_114 = arith.constant 0 : index
    %323 = vector.load %arg27[%c0_113, %c0_114] : memref<16x2xf32, #tpu.memory_space<vmem>>, vector<16x2xf32>
    tpu.vector_store %arg27[%c0_113, %c0_114], %322 {strides = array<i32>} : memref<16x2xf32, #tpu.memory_space<vmem>>, vector<16x2xf32>,
    return
  }
  func.func @transform_0(%arg0: i32) -> (i32, i32) {
    %c0_i32 = arith.constant 0 : i32
    %c0_i32_0 = arith.constant 0 : i32
    %c0_i32_1 = arith.constant 0 : i32
    return %c0_i32, %c0_i32_0 : i32, i32
  }
  func.func @transform_1(%arg0: i32) -> (i32, i32) {
    %c0_i32 = arith.constant 0 : i32
    %c0_i32_0 = arith.constant 0 : i32
    %c0_i32_1 = arith.constant 0 : i32
    return %c0_i32, %c0_i32_0 : i32, i32
  }
  func.func @transform_2(%arg0: i32) -> (i32, i32) {
    %c0_i32 = arith.constant 0 : i32
    %c0_i32_0 = arith.constant 0 : i32
    %c0_i32_1 = arith.constant 0 : i32
    return %c0_i32, %c0_i32_0 : i32, i32
  }
  func.func @transform_3(%arg0: i32) -> (i32, i32) {
    %c0_i32 = arith.constant 0 : i32
    %c0_i32_0 = arith.constant 0 : i32
    %c0_i32_1 = arith.constant 0 : i32
    return %c0_i32, %c0_i32_0 : i32, i32
  }
  func.func @transform_4(%arg0: i32) -> (i32, i32) {
    %c0_i32 = arith.constant 0 : i32
    %c0_i32_0 = arith.constant 0 : i32
    %c0_i32_1 = arith.constant 0 : i32
    return %c0_i32, %c0_i32_0 : i32, i32
  }
  func.func @transform_5(%arg0: i32) -> (i32, i32) {
    %c0_i32 = arith.constant 0 : i32
    %c0_i32_0 = arith.constant 0 : i32
    %c0_i32_1 = arith.constant 0 : i32
    return %c0_i32, %c0_i32_0 : i32, i32
  }
  func.func @transform_6(%arg0: i32) -> (i32, i32) {
    %c0_i32 = arith.constant 0 : i32
    %c0_i32_0 = arith.constant 0 : i32
    %c0_i32_1 = arith.constant 0 : i32
    return %c0_i32, %c0_i32_0 : i32, i32
  }
  func.func @transform_7(%arg0: i32) -> (i32, i32) {
    %c0_i32 = arith.constant 0 : i32
    %c0_i32_0 = arith.constant 0 : i32
    %c0_i32_1 = arith.constant 0 : i32
    return %c0_i32, %c0_i32_0 : i32, i32
  }
  func.func @transform_8(%arg0: i32) -> (i32, i32) {
    %c0_i32 = arith.constant 0 : i32
    %c0_i32_0 = arith.constant 0 : i32
    %c0_i32_1 = arith.constant 0 : i32
    return %c0_i32, %c0_i32_0 : i32, i32
  }
  func.func @transform_9(%arg0: i32) -> (i32, i32) {
    %c0_i32 = arith.constant 0 : i32
    %c0_i32_0 = arith.constant 0 : i32
    %c0_i32_1 = arith.constant 0 : i32
    return %c0_i32, %c0_i32_0 : i32, i32
  }
  func.func @transform_10(%arg0: i32) -> (i32, i32) {
    %c0_i32 = arith.constant 0 : i32
    %c0_i32_0 = arith.constant 0 : i32
    %c0_i32_1 = arith.constant 0 : i32
    return %c0_i32, %c0_i32_0 : i32, i32
  }
  func.func @transform_11(%arg0: i32) -> (i32, i32) {
    %c0_i32 = arith.constant 0 : i32
    %c0_i32_0 = arith.constant 0 : i32
    %c0_i32_1 = arith.constant 0 : i32
    return %c0_i32, %c0_i32_0 : i32, i32
  }
  func.func @transform_12(%arg0: i32) -> (i32, i32) {
    %c0_i32 = arith.constant 0 : i32
    %c0_i32_0 = arith.constant 0 : i32
    %c0_i32_1 = arith.constant 0 : i32
    return %c0_i32, %c0_i32_0 : i32, i32
  }
  func.func @transform_13(%arg0: i32) -> (i32, i32) {
    %c0_i32 = arith.constant 0 : i32
    %c0_i32_0 = arith.constant 0 : i32
    %c0_i32_1 = arith.constant 0 : i32
    return %c0_i32, %c0_i32_0 : i32, i32
  }
  func.func @transform_14(%arg0: i32) -> (i32, i32) {
    %c0_i32 = arith.constant 0 : i32
    %c0_i32_0 = arith.constant 0 : i32
    %c0_i32_1 = arith.constant 0 : i32
    return %c0_i32, %c0_i32_0 : i32, i32
  }
  func.func @transform_15(%arg0: i32) -> (i32, i32) {
    %c0_i32 = arith.constant 0 : i32
    %c0_i32_0 = arith.constant 0 : i32
    %c0_i32_1 = arith.constant 0 : i32
    return %c0_i32, %c0_i32_0 : i32, i32
  }
  func.func @transform_16(%arg0: i32) -> (i32, i32) {
    %c0_i32 = arith.constant 0 : i32
    %c0_i32_0 = arith.constant 0 : i32
    %c0_i32_1 = arith.constant 0 : i32
    return %c0_i32, %c0_i32_0 : i32, i32
  }
  func.func @transform_17(%arg0: i32) -> (i32, i32) {
    %c0_i32 = arith.constant 0 : i32
    %c0_i32_0 = arith.constant 0 : i32
    %c0_i32_1 = arith.constant 0 : i32
    return %c0_i32, %c0_i32_0 : i32, i32
  }
  func.func @transform_18(%arg0: i32) -> (i32, i32) {
    %c0_i32 = arith.constant 0 : i32
    %c0_i32_0 = arith.constant 0 : i32
    %c0_i32_1 = arith.constant 0 : i32
    return %c0_i32, %c0_i32_0 : i32, i32
  }
  func.func @transform_19(%arg0: i32) -> (i32, i32) {
    %c0_i32 = arith.constant 0 : i32
    %c0_i32_0 = arith.constant 0 : i32
    %c0_i32_1 = arith.constant 0 : i32
    return %c0_i32, %c0_i32_0 : i32, i32
  }
  func.func @transform_20(%arg0: i32) -> (i32, i32) {
    %c0_i32 = arith.constant 0 : i32
    %c0_i32_0 = arith.constant 0 : i32
    %c0_i32_1 = arith.constant 0 : i32
    return %c0_i32, %c0_i32_0 : i32, i32
  }
  func.func @transform_21(%arg0: i32) -> (i32, i32) {
    %c0_i32 = arith.constant 0 : i32
    %c0_i32_0 = arith.constant 0 : i32
    %c0_i32_1 = arith.constant 0 : i32
    return %c0_i32, %c0_i32_0 : i32, i32
  }
  func.func @transform_22(%arg0: i32) -> (i32, i32) {
    %c0_i32 = arith.constant 0 : i32
    %c0_i32_0 = arith.constant 0 : i32
    %c0_i32_1 = arith.constant 0 : i32
    return %c0_i32, %c0_i32_0 : i32, i32
  }
  func.func @transform_23(%arg0: i32) -> (i32, i32) {
    %c0_i32 = arith.constant 0 : i32
    %c0_i32_0 = arith.constant 0 : i32
    %c0_i32_1 = arith.constant 0 : i32
    return %c0_i32, %c0_i32_0 : i32, i32
  }
  func.func @transform_24(%arg0: i32) -> (i32, i32) {
    %c0_i32 = arith.constant 0 : i32
    %c0_i32_0 = arith.constant 0 : i32
    %c0_i32_1 = arith.constant 0 : i32
    return %c0_i32, %c0_i32_0 : i32, i32
  }
  func.func @transform_25(%arg0: i32) -> (i32, i32) {
    %c0_i32 = arith.constant 0 : i32
    %c0_i32_0 = arith.constant 0 : i32
    %c0_i32_1 = arith.constant 0 : i32
    return %c0_i32, %c0_i32_0 : i32, i32
  }
  func.func @transform_26(%arg0: i32) -> (i32, i32) {
    %c0_i32 = arith.constant 0 : i32
    %c0_i32_0 = arith.constant 0 : i32
    %c0_i32_1 = arith.constant 0 : i32
    return %c0_i32, %c0_i32_0 : i32, i32
  }
}

</mosaic_0001>

<bundles_post_ra>
// kernel: critic_rnn_forward.1
= control target key start
LH: loop header
LB: loop body
LE: loop exit
PB: predicated region body
PF: predicated region fallthrough
CT: control target
= control target key end

     0   :  { %s2169_s0 = inlined_call_operand.vmem [shape: f32[16,4], index: 0, kind: input, shape index: {}]   ;;  %s2170_s1 = inlined_call_operand.vmem [shape: f32[16,1], index: 1, kind: input, shape index: {}]   ;;  %s2171_s2 = inlined_call_operand.vmem [shape: f32[16,10], index: 2, kind: input, shape index: {}]   ;;  %s2172_s3 = inlined_call_operand.vmem [shape: f32[16,4], index: 3, kind: input, shape index: {}]   ;;  %s2173_s4 = inlined_call_operand.hbm [shape: f32[4,8], index: 4, kind: input, shape index: {}]   ;;  %s2174_s5 = inlined_call_operand.vmem [shape: f32[1,8], index: 5, kind: input, shape index: {}]   ;;  %s2175_s6 = inlined_call_operand.vmem [shape: f32[1,8], index: 6, kind: input, shape index: {}]   ;;  %s2176_s7 = inlined_call_operand.vmem [shape: f32[1,8], index: 7, kind: input, shape index: {}]   ;;  %s2177_s8 = inlined_call_operand.vmem [shape: f32[10,16], index: 8, kind: input, shape index: {}]   ;;  %s2178_s9 = inlined_call_operand.vmem [shape: f32[1,16], index: 9, kind: input, shape index: {}]   ;;  %s2179_s10 = inlined_call_operand.hbm [shape: f32[8,96], index: 10, kind: input, shape index: {}]   ;;  %s2180_s11 = inlined_call_operand.hbm [shape: f32[8,96], index: 11, kind: input, shape index: {}]   ;;  %s2181_s12 = inlined_call_operand.hbm [shape: f32[16,96], index: 12, kind: input, shape index: {}]   ;;  %s2182_s13 = inlined_call_operand.vmem [shape: f32[1,96], index: 13, kind: input, shape index: {}]   ;;  %s2183_s14 = inlined_call_operand.vmem [shape: f32[32,96], index: 14, kind: input, shape index: {}]   ;;  %s2184_s15 = inlined_call_operand.hbm [shape: f32[1,96], index: 15, kind: input, shape index: {}]   ;;  %s2185_s16 = inlined_call_operand.vmem [shape: f32[10,32], index: 16, kind: input, shape index: {}]   ;;  %s2186_s17 = inlined_call_operand.hbm [shape: f32[4,32], index: 17, kind: input, shape index: {}]   ;;  %s2187_s18 = inlined_call_operand.hbm [shape: f32[1,32], index: 18, kind: input, shape index: {}]   ;;  %s2188_s19 = inlined_call_operand.hbm [shape: f32[32,64], index: 19, kind: input, shape index: {}]   ;;  %s2189_s20 = inlined_call_operand.hbm [shape: f32[32,64], index: 20, kind: input, shape index: {}]   ;;  %s2190_s21 = inlined_call_operand.hbm [shape: f32[1,64], index: 21, kind: input, shape index: {}]   ;;  %s2191_s22 = inlined_call_operand.vmem [shape: f32[64,64], index: 22, kind: input, shape index: {}]   ;;  %s2192_s23 = inlined_call_operand.hbm [shape: f32[1,64], index: 23, kind: input, shape index: {}]   ;;  %s2193_s24 = inlined_call_operand.vmem [shape: f32[64,2], index: 24, kind: input, shape index: {}]   ;;  %s2194_s25 = inlined_call_operand.hbm [shape: f32[1,2], index: 25, kind: input, shape index: {}]   ;;  %s2195_s26 = inlined_call_operand.vmem [shape: f32[16,2], index: 26, kind: output, shape index: {}]  }
   0x1   :  { %2201 = sst [smem:[#allocation29_spill]] %s2169_s0 }
   0x2   :  { %2202 = sst [smem:[#allocation30_spill]] %s2170_s1 }
   0x3   :  { %2203 = sst [smem:[#allocation31_spill]] %s2171_s2 }
   0x4   :  { %2204 = sst [smem:[#allocation32_spill]] %s2172_s3 }
   0x5   :  { %2205 = sst [smem:[#allocation33_spill]] %s2173_s4 }
   0x6   :  { %2206 = sst [smem:[#allocation34_spill]] %s2174_s5 }
   0x7   :  { %2207 = sst [smem:[#allocation35_spill]] %s2175_s6 }
   0x8   :  { %2208 = sst [smem:[#allocation36_spill]] %s2176_s7 }
   0x9   :  { %2209 = sst [smem:[#allocation37_spill]] %s2177_s8 }
   0xa   :  { %2210 = sst [smem:[#allocation38_spill]] %s2178_s9 }
   0xb   :  { %2211 = sst [smem:[#allocation39_spill]] %s2179_s10 }
   0xc   :  { %31 = vsyncpa [#allocation4], 0 }
   0xd   :  { %32 = vsyncpa [#allocation6], 0 }
   0xe   :  { %33 = vsyncpa [#allocation9], 0 }
   0xf   :  { %34 = vsyncpa [#allocation12], 0 }
  0x10   :  { %35 = vsyncpa [#allocation15], 0 }
  0x11   :  { %36 = vsyncpa [#allocation18], 0  ;;  %s2212_s7 = sld [smem:[#allocation39_spill]] }
  0x17   :  { %s72_s28 = sshll.u32 %s2212_s7, 4  ;;  %s73_s28 = int_to_ptr.hbm [resolvable:$true] %s72_s28 }
  0x18   :  { %37 = vsyncpa [#allocation21], 0  ;;  %s1724_s8 = smov [#allocation5]   ;;  %s93_s9 = sshll.u32 %s2181_s12, 4  ;;  %s94_s9 = int_to_ptr.hbm [resolvable:$true] %s93_s9 }
  0x19   :  { %s74_s4 = sshll.u32 %s1724_s8, 4  ;;  %s1725_s30 = smov [#allocation8]   ;;  %s75_s4 = int_to_ptr.vmem [resolvable:$true] %s74_s4 }
  0x1a   :  { %77 = dma.hbm_to_vmem [thread:$0]  %s73_s28, 128, %s75_s4, [#allocation6]  }
  0x1b   :  { %s95_s2 = sshll.u32 %s1725_s30, 4  ;;  %s1726_s5 = smov 128   ;;  %s96_s2 = int_to_ptr.vmem [resolvable:$true] %s95_s2 }
  0x1c   :  { %s1727_s10 = smov 8   ;;  %s124_s27 = sshll.u32 %s2186_s17, 4  ;;  %s125_s27 = int_to_ptr.hbm [resolvable:$true] %s124_s27 }
  0x1d   :  { %101 = dma.hbm_to_vmem [thread:$0]  %s94_s9, 256, %s96_s2, [#allocation9], %s1726_s5, %s1726_s5, %s1727_s10  }
  0x1e   :  { %s1728_s3 = smov [#allocation11]   ;;  %s145_s8 = sshll.u32 %s2188_s19, 4  ;;  %s146_s8 = int_to_ptr.hbm [resolvable:$true] %s145_s8 }
  0x1f   :  { %s126_s7 = sshll.u32 %s1728_s3, 4  ;;  %s1729_s4 = smov [#allocation14]   ;;  %s127_s7 = int_to_ptr.vmem [resolvable:$true] %s126_s7 }
  0x20   :  { %129 = dma.hbm_to_vmem [thread:$0]  %s125_s27, 64, %s127_s7, [#allocation12]  }
  0x21   :  { %s147_s29 = sshll.u32 %s1729_s4, 4  ;;  %s172_s9 = sshll.u32 %s2190_s21, 4  ;;  %s148_s29 = int_to_ptr.vmem [resolvable:$true] %s147_s29  ;;  %s173_s9 = int_to_ptr.hbm [resolvable:$true] %s172_s9 }
  0x22   :  { %153 = dma.hbm_to_vmem [thread:$0]  %s146_s8, 512, %s148_s29, [#allocation15], %s1726_s5, %s1726_s5, %s1727_s10  }
  0x23   :  { %s2213_s6 = sld [smem:[#allocation33_spill]]  ;;  %s1730_s3 = smov [#allocation17]  }
  0x24   :  { %s174_s19 = sshll.u32 %s1730_s3, 4  ;;  %s1731_s27 = smov [#allocation3]   ;;  %s175_s19 = int_to_ptr.vmem [resolvable:$true] %s174_s19 }
  0x25   :  { %177 = dma.hbm_to_vmem [thread:$0]  %s173_s9, 16, %s175_s19, [#allocation18]  }
  0x26   :  { %s53_s7 = sshll.u32 %s1731_s27, 4  ;;  %s83_s21 = sshll.u32 %s2180_s11, 4  ;;  %s54_s7 = int_to_ptr.vmem [resolvable:$true] %s53_s7  ;;  %s84_s21 = int_to_ptr.hbm [resolvable:$true] %s83_s21 }
  0x27   :  { %s111_s29 = sshll.u32 %s2184_s15, 4  ;;  %s1732_s0 = smov [#allocation7]   ;;  %s112_s29 = int_to_ptr.hbm [resolvable:$true] %s111_s29 }
  0x28   :  { %s85_s30 = sshll.u32 %s1732_s0, 4  ;;  %s1733_s17 = smov [#allocation10]   ;;  %s86_s30 = int_to_ptr.vmem [resolvable:$true] %s85_s30 }
  0x29   :  { %s51_s1 = sshll.u32 %s2213_s6, 4  ;;  %s113_s9 = sshll.u32 %s1733_s17, 4  ;;  %s52_s1 = int_to_ptr.hbm [resolvable:$true] %s51_s1  ;;  %s114_s9 = int_to_ptr.vmem [resolvable:$true] %s113_s9 }
  0x2a   :  { %56 = dma.hbm_to_vmem [thread:$0]  %s52_s1, 64, %s54_s7, [#allocation4]  }
  0x2b   :  { %88 = dma.hbm_to_vmem [thread:$0]  %s84_s21, 128, %s86_s30, [#allocation6]  }
  0x2c   :  { %s135_s3 = sshll.u32 %s2187_s18, 4  ;;  %s158_s19 = sshll.u32 %s2189_s20, 4  ;;  %s136_s3 = int_to_ptr.hbm [resolvable:$true] %s135_s3  ;;  %s159_s19 = int_to_ptr.hbm [resolvable:$true] %s158_s19 }
  0x2d   :  { %116 = dma.hbm_to_vmem [thread:$0]  %s112_s29, 16, %s114_s9, [#allocation9]  }
  0x2e   :  { %s1734_s27 = smov [#allocation13]   ;;  %s1735_s7 = smov [#allocation16]  }
  0x2f   :  { %s137_s15 = sshll.u32 %s1734_s27, 4  ;;  %s160_s12 = sshll.u32 %s1735_s7, 4  ;;  %s138_s15 = int_to_ptr.vmem [resolvable:$true] %s137_s15  ;;  %s161_s12 = int_to_ptr.vmem [resolvable:$true] %s160_s12 }
  0x30   :  { %140 = dma.hbm_to_vmem [thread:$0]  %s136_s3, 16, %s138_s15, [#allocation12]  }
  0x31   :  { %s185_s4 = sshll.u32 %s2192_s23, 4  ;;  %s198_s20 = sshll.u32 %s2194_s25, 4  ;;  %s186_s4 = int_to_ptr.hbm [resolvable:$true] %s185_s4  ;;  %s199_s20 = int_to_ptr.hbm [resolvable:$true] %s198_s20 }
  0x32   :  { %166 = dma.hbm_to_vmem [thread:$0]  %s159_s19, 512, %s161_s12, [#allocation15], %s1726_s5, %s1726_s5, %s1727_s10  }
  0x33   :  { %s1736_s29 = smov [#allocation19]   ;;  %s1737_s30 = smov [#allocation20]  }
  0x34   :  { %s187_s0 = sshll.u32 %s1736_s29, 4  ;;  %s200_s17 = sshll.u32 %s1737_s30, 4  ;;  %s188_s0 = int_to_ptr.vmem [resolvable:$true] %s187_s0  ;;  %s201_s17 = int_to_ptr.vmem [resolvable:$true] %s200_s17 }
  0x35   :  { %190 = dma.hbm_to_vmem [thread:$0]  %s186_s4, 16, %s188_s0, [#allocation18]  }
  0x36   :  { %203 = dma.hbm_to_vmem [thread:$0]  %s199_s20, 16, %s201_s17, [#allocation21]  }
  0x37   :  { %1710 = dma.done.wait [#allocation4], 64  }
  0x38   :  { %1711 = vsyncadd [#allocation4], 4294967232 }
  0x39   :  { %1712 = dma.done.wait [#allocation6], 256  }
  0x3a   :  { %1713 = vsyncadd [#allocation6], 4294967040 }
  0x3b   :  { %1714 = dma.done.wait [#allocation9], 272  }
  0x3c   :  { %1715 = vsyncadd [#allocation9], 4294967024 }
  0x3d   :  { %1716 = dma.done.wait [#allocation12], 80  }
  0x3e   :  { %1717 = vsyncadd [#allocation12], 4294967216 }
  0x3f   :  { %1718 = dma.done.wait [#allocation15], 1024  }
  0x40   :  { %1719 = vsyncadd [#allocation15], 4294966272 }
  0x41   :  { %1720 = dma.done.wait [#allocation18], 32  }
  0x42   :  { %1721 = vsyncadd [#allocation18], 4294967264 }
  0x43   :  { %1722 = dma.done.wait [#allocation21], 16  }
  0x44   :  { %1723 = vsyncadd [#allocation21], 4294967280  ;;  %v1738_v0 = vmov 0   ;;  %vm266_vm0 = vcmask 1043456   ;;  %vm259_vm1 = vcmask 31744   ;;  %s2214_s5 = sld [smem:[#allocation30_spill]] }
  0x45   :  { %1363 = vset.pattern.permute.xlu0 %v1738_v0  ;;  %v254_v2 = vld [vmem:[#allocation3] sm:$0xf]  ;;  %s2215_s2 = sld [smem:[#allocation29_spill]]  ;;  %vm336_vm2 = vcmask 1041408   ;;  %vm329_vm3 = vcmask 80896   ;;  %v366_v10 = vld [vmem:[#allocation7] sm:$0xff] }
  0x46   :  { %1302 = vmatpush.msk.msra.mxu0 %vm266_vm0, %v254_v2  ;;  %s2216_s11 = sld [smem:[#allocation37_spill]]  ;;  %389 = vmatpush.msra.mxu2 %v366_v10  ;;  %v469_v11 = vld [vmem:[%s2183_s14 + $0x18] sm:$0xff]  ;;  %v468_v12 = vld [vmem:[%s2183_s14 + $0x10] sm:$0xff]  ;;  %v467_v13 = vld [vmem:[%s2183_s14 + $0x8] sm:$0xff]  ;;  %vm367_vm4 = vcmask 64512   ;;  %v1739_v35 = vmov 0.0  }
  0x47   :  { %s2217_s7 = sld [smem:[#allocation31_spill]]  ;;  %v365_v14 = vld [vmem:[#allocation5] sm:$0xff]  ;;  %v466_v15 = vld [vmem:[%s2183_s14] sm:$0xff]  ;;  %v427_v17 = vld [vmem:[#allocation8 + $0x8] sm:$0xff]  ;;  %vm428_vm5 = vcmask 130048   ;;  %s1740_s12 = smov 64  }
  0x48   :  { %490 = vmatpush.msrb.mxu2 %v469_v11  ;;  %418 = vmatpush.msra.mxu3 %v365_v14  ;;  %s2219_s14 = sld [smem:[#allocation36_spill]]  ;;  %v426_v19 = vld [vmem:[#allocation8] sm:$0xff]  ;;  %v1987_v45 = vld [vmem:[#allocation10] ss:$0 sm:$0xff]  ;;  %v1369_v53 = vld [vmem:[%s2182_s13] ss:$0 sm:$0xff] }
  0x49   :  { %s2220_s19 = sld [smem:[#allocation34_spill]]  ;;  %s1741_s13 = smov 96   ;;  %vm541_vm10 = vcmask 254976   ;;  %vm474_vm11 = vcmask 261120  }
  0x4a   :  { %v295_v1 = vld [vmem:[%s2214_s5] sm:$0xff]  ;;  %v296_v7 = vld [vmem:[%s2214_s5 + $0x8] sm:$0xff]  ;;  %491 = vmatpush.msrb.mxu2 %v468_v12  ;;  %557 = vmatpush.msrb.mxu3 %v469_v11  ;;  %s2222_s8 = sld [smem:[#allocation32_spill]] }
  0x4b   :  { %v252_v3 = vld [vmem:[%s2215_s2] sm:$0xff]  ;;  %300 = vperm.xlu0 %1363, %v295_v1   ;;  %v253_v8 = vld [vmem:[%s2215_s2 + $0x8] sm:$0xff]  ;;  %s2218_s2 = sld [smem:[#allocation35_spill]] }
  0x4c   :  { %v324_v4 = vld [vmem:[%s2216_s11 + $0x8] sm:$0x3]  ;;  %1303 = vmatmul.msk.f32.vlgmr.msra.gmra.mxu0 %vm259_vm1, %v252_v3  ;;  %v323_v5 = vld [vmem:[%s2216_s11] sm:$0xff]  ;;  %492 = vmatpush.msrb.mxu2 %v467_v13 }
  0x4d   :  { %1343 = vmatpush.msk.msra.mxu1 %vm336_vm2, %v324_v4  ;;  %v1940_v6 = vld [vmem:[%s2217_s7 + $0x8] sm:$0xff]  ;;  %1305 = vmatpush.msk.msrb.mxu0 %vm336_vm2, %v324_v4  ;;  %v1955_v9 = vld [vmem:[%s2217_s7] sm:$0xff]  ;;  %s2221_s7 = sld [smem:[#allocation38_spill]] }
  0x4e   :  { %493 = vmatpush.msrb.mxu2 %v466_v15  ;;  %558 = vmatpush.msrb.mxu3 %v468_v12  ;;  %v1365_v18 = vld [vmem:[%s2219_s14] ss:$0 sm:$0xff] }
  0x4f   :  { %1344 = vmatpush.msra.mxu1 %v323_v5  ;;  %355 = vmatpush.msrb.mxu0 %v323_v5  ;;  %v1366_v26 = vld [vmem:[%s2220_s19] ss:$0 sm:$0xff] }
  0x50   :  { %1307 = vmatmul.msk.f32.vlgmr.msra.gmra.mxu1 %vm329_vm3, %v1940_v6  ;;  %559 = vmatpush.msrb.mxu3 %v467_v13 }
  0x51   :  { %631 = vmatpush.msrb.mxu1 %v469_v11  ;;  %v1364_v16 = vld [vmem:[%s2218_s2] ss:$0 sm:$0xff]  ;;  %449 = vmatpush.msra.mxu0 %v427_v17 }
  0x52   :  { %560 = vmatpush.msrb.mxu3 %v466_v15 }
  0x53   :  { %305 = vperm.xlu0 %1363, %v296_v7   ;;  %632 = vmatpush.msrb.mxu1 %v468_v12  ;;  %v1367_v36 = vld [vmem:[%s2221_s7] ss:$0 sm:$0xff] }
  0x54   :  { %1304 = vmatmul.msk.f32.gmra.mxu0 %vm259_vm1, %v253_v8 }
  0x55   :  { %633 = vmatpush.msrb.mxu1 %v467_v13  ;;  %450 = vmatpush.msra.mxu0 %v426_v19 }
  0x57   :  { %634 = vmatpush.msrb.mxu1 %v466_v15 }
  0x59   :  { %846 = vmatpush.msra.mxu1 %v469_v11 }
  0x5b   :  { %847 = vmatpush.msra.mxu1 %v468_v12 }
  0x5c   :  { %1306 = vmatmul.msk.f32.vlgmr.msrb.gmra.mxu0 %vm329_vm3, %v1955_v9 }
  0x5d   :  { %848 = vmatpush.msra.mxu1 %v467_v13  ;;  %919 = vmatpush.msrb.mxu0 %v469_v11 }
  0x5f   :  { %849 = vmatpush.msra.mxu1 %v466_v15  ;;  %920 = vmatpush.msrb.mxu0 %v468_v12 }
  0x61   :  { %921 = vmatpush.msrb.mxu0 %v467_v13 }
  0x63   :  { %922 = vmatpush.msrb.mxu0 %v466_v15 }
  0xbd   :  { %v301_v20 = vpop.permute.xlu0 %300 }
  0xbe   :  { %v311_v21 = vmul.f32 %v1364_v16, %v301_v20 }
  0xc0   :  { %v317_v22 = vadd.f32 %v1365_v18, %v311_v21 }
  0xc2   :  { %v319_v23 = vmax.f32 %v317_v22, 0.0 }
  0xc4   :  { %1308 = vmatmul.msk.f32.vlgmr.msra.gmra.mxu2 %vm367_vm4, %v319_v23 }
  0xc5   :  { %v306_v24 = vpop.permute.xlu0 %305  ;;  %705 = vmatpush.msra.mxu2 %v469_v11 }
  0xc6   :  { %v312_v25 = vmul.f32 %v1364_v16, %v306_v24 }
  0xc7   :  { %706 = vmatpush.msra.mxu2 %v468_v12 }
  0xc8   :  { %v318_v27 = vadd.f32 %v1365_v18, %v312_v25 }
  0xc9   :  { %v287_v28 = vpop.f32.mrf.mxu0  ;;  %707 = vmatpush.msra.mxu2 %v467_v13 }
  0xca   :  { %v320_v29 = vmax.f32 %v318_v27, 0.0  ;;  %v288_v30 = vadd.f32 %v1366_v26, %v287_v28 }
  0xcb   :  { %708 = vmatpush.msra.mxu2 %v466_v15 }
  0xcc   :  { %v293_v31 = vmax.f32 %v288_v30, 0.0  ;;  %1309 = vmatmul.msk.f32.gmra.mxu2 %vm367_vm4, %v320_v29 }
  0xcd   :  { %v360_v39 = vpop.f32.mrf.mxu1 }
  0xce   :  { %1310 = vmatmul.msk.f32.vlgmr.msra.gmra.mxu3 %vm367_vm4, %v293_v31  ;;  %v361_v41 = vadd.f32 %v1367_v36, %v360_v39 }
  0xcf   :  { %779 = vmatpush.msra.mxu3 %v469_v11 }
  0xd0   :  { %v364_v42 = vmax.f32 %v361_v41, 0.0 }
  0xd1   :  { %v290_v32 = vpop.f32.mrf.mxu0  ;;  %780 = vmatpush.msra.mxu3 %v468_v12 }
  0xd2   :  { %v291_v33 = vadd.f32 %v1366_v26, %v290_v32 }
  0xd3   :  { %781 = vmatpush.msra.mxu3 %v467_v13 }
  0xd4   :  { %v294_v34 = vmax.f32 %v291_v33, 0.0  ;;  %494 = vmatmul.f32.vlgmr.msrb.gmra.mxu2 %v1739_v35 }
  0xd5   :  { %782 = vmatpush.msra.mxu3 %v466_v15  ;;  %992 = vmatpush.msrb.mxu2 %v469_v11 }
  0xd6   :  { %1311 = vmatmul.msk.f32.gmra.mxu3 %vm367_vm4, %v294_v34 }
  0xd7   :  { %993 = vmatpush.msrb.mxu2 %v468_v12 }
  0xd9   :  { %v357_v37 = vpop.f32.mrf.mxu0  ;;  %994 = vmatpush.msrb.mxu2 %v467_v13 }
  0xda   :  { %v358_v38 = vadd.f32 %v1367_v36, %v357_v37 }
  0xdb   :  { %995 = vmatpush.msrb.mxu2 %v466_v15 }
  0xdc   :  { %v363_v40 = vmax.f32 %v358_v38, 0.0 }
  0xde   :  { %1312 = vmatmul.msk.f32.vlgmr.msra.gmra.mxu0 %vm428_vm5, %v363_v40 }
  0xe6   :  { %1313 = vmatmul.msk.f32.gmra.mxu0 %vm428_vm5, %v364_v42 }
 0x147   :  { %v391_v43 = vpop.f32.mrf.mxu2 }
 0x14f   :  { %v394_v44 = vpop.f32.mrf.mxu2 }
 0x151   :  { %v420_v46 = vpop.f32.mrf.mxu3 }
 0x152   :  { %v421_v56 = vadd.f32 %v420_v46, %v391_v43 }
 0x157   :  { %v495_v47 = vpop.f32.mrf.mxu2 }
 0x158   :  { %v496_v48 = vadd.f32 %v1987_v45, %v495_v47 }
 0x159   :  { %v423_v50 = vpop.f32.mrf.mxu3 }
 0x15a   :  { %519 = vrot.lane.b32.xlu1 %v496_v48, %s1740_s12  ;;  %v424_v51 = vadd.f32 %v423_v50, %v394_v44 }
 0x15b   :  { %v452_v49 = vpop.f32.mrf.mxu0 }
 0x15c   :  { %v458_v57 = vadd.f32 %v452_v49, %v421_v56 }
 0x15e   :  { %v1996_v58 = vadd.f32 %v1369_v53, %v458_v57 }
 0x160   :  { %v498_v59 = vadd.f32 %v496_v48, %v1996_v58 }
 0x162   :  { %v1314_v60 = vmul.f32 -1.442695, %v498_v59 }
 0x163   :  { %v455_v52 = vpop.f32.mrf.mxu0 }
 0x164   :  { %v459_v54 = vadd.f32 %v455_v52, %v424_v51  ;;  %1374 = vpow2.f32 %v1314_v60 }
 0x166   :  { %v1994_v55 = vadd.f32 %v1369_v53, %v459_v54 }
 0x16a   :  { %v1375_v61 = vpop.eup %1374 }
 0x16b   :  { %v502_v62 = vadd.f32 1.0, %v1375_v61 }
 0x16d   :  { %1376 = vrcp.f32 %v502_v62  ;;  %v514_v4 = vand.u32 2147483648, %v502_v62  ;;  %vm508_vm7 = vweird.f32 %v502_v62  ;;  %v512_v5 = vand.u32 2147483647, %v502_v62 }
 0x16f   :  { %v515_v8 = vor.u32 1.1754944e-38, %v514_v4  ;;  %vm513_vm9 = vcmp.eq.f32.partialorder %v512_v5, 8.507059e+37 }
 0x173   :  { %v1377_v63 = vpop.eup %1376 }
 0x174   :  { %v504_v0 = vmul.f32 %v1377_v63, %v502_v62  ;;  %vm509_vm6 = vweird.f32 %v1377_v63 }
 0x175   :  { %vm510_vm8 = vmor %vm508_vm7, %vm509_vm6 }
 0x176   :  { %v505_v1 = vsub.f32 1.0, %v504_v0 }
 0x178   :  { %v506_v2 = vmul.f32 %v1377_v63, %v505_v1 }
 0x17a   :  { %v507_v3 = vadd.f32 %v1377_v63, %v506_v2 }
 0x17c   :  { %v511_v7 = vsel %vm510_vm8, %v1377_v63, %v507_v3 }
 0x17d   :  { %v516_v11 = vsel %vm513_vm9, %v515_v8, %v511_v7 }
 0x17e   :  { %v529_v16 = vsub.f32 1.0, %v516_v11  ;;  %v535_v18 = vmul.f32 0.0, %v516_v11 }
 0x1cc   :  { %v520_v10 = vpop.permute.xlu1 %519 }
 0x1cd   :  { %v522_v12 = vmul.f32 %v520_v10, %v516_v11 }
 0x1cf   :  { %524 = vrot.lane.b32.xlu1 %v522_v12, %s1740_s12 }
 0x241   :  { %v525_v13 = vpop.permute.xlu1 %524 }
 0x242   :  { %v527_v14 = vadd.f32 %v525_v13, %v1996_v58 }
 0x244   :  { %1378 = vtanh.f32 %v527_v14 }
 0x24a   :  { %v1379_v15 = vpop.eup %1378 }
 0x24b   :  { %531 = vrot.lane.b32.xlu2 %v1379_v15, %s1741_s13 }
 0x2a5   :  { %v532_v17 = vpop.permute.xlu2 %531 }
 0x2a6   :  { %v534_v19 = vmul.f32 %v532_v17, %v529_v16 }
 0x2a8   :  { %v536_v20 = vadd.f32 %v535_v18, %v534_v19 }
 0x2aa   :  { %538 = vrot.lane.b32.xlu2 %v536_v20, %s1741_s13  ;;  %v604_v44 = vrot.slane %v536_v20, 6 }
 0x304   :  { %v539_v21 = vpop.permute.xlu2 %538 }
 0x305   :  { %542 = vst.msk [vmem:[#allocation2] sm:$0x3] %vm541_vm10, %v539_v21  ;;  %1315 = vmatmul.msk.f32.vlgmr.msrb.gmra.mxu3 %vm474_vm11, %v539_v21 }
 0x388   :  { %v562_v22 = vpop.f32.mrf.mxu3 }
 0x389   :  { %v563_v23 = vadd.f32 %v1987_v45, %v562_v22 }
 0x38b   :  { %v566_v24 = vrot.slane %v563_v23, 6 }
 0x38d   :  { %588 = vrot.lane.b32.xlu0 %v566_v24, %s1740_s12  ;;  %v568_v25 = vadd.f32 %v566_v24, %v1996_v58 }
 0x38f   :  { %v1316_v26 = vmul.f32 -1.442695, %v568_v25 }
 0x391   :  { %1380 = vpow2.f32 %v1316_v26 }
 0x397   :  { %v1381_v27 = vpop.eup %1380 }
 0x398   :  { %v572_v28 = vadd.f32 1.0, %v1381_v27 }
 0x39a   :  { %1382 = vrcp.f32 %v572_v28  ;;  %v584_v34 = vand.u32 2147483648, %v572_v28  ;;  %vm578_vm13 = vweird.f32 %v572_v28  ;;  %v582_v35 = vand.u32 2147483647, %v572_v28 }
 0x39c   :  { %v585_v37 = vor.u32 1.1754944e-38, %v584_v34  ;;  %vm583_vm15 = vcmp.eq.f32.partialorder %v582_v35, 8.507059e+37 }
 0x3a0   :  { %v1383_v29 = vpop.eup %1382 }
 0x3a1   :  { %v574_v30 = vmul.f32 %v1383_v29, %v572_v28  ;;  %vm579_vm12 = vweird.f32 %v1383_v29 }
 0x3a2   :  { %vm580_vm14 = vmor %vm578_vm13, %vm579_vm12 }
 0x3a3   :  { %v575_v31 = vsub.f32 1.0, %v574_v30 }
 0x3a5   :  { %v576_v32 = vmul.f32 %v1383_v29, %v575_v31 }
 0x3a7   :  { %v577_v33 = vadd.f32 %v1383_v29, %v576_v32 }
 0x3a9   :  { %v581_v36 = vsel %vm580_vm14, %v1383_v29, %v577_v33 }
 0x3aa   :  { %v586_v39 = vsel %vm583_vm15, %v585_v37, %v581_v36 }
 0x3ab   :  { %v598_v46 = vsub.f32 1.0, %v586_v39  ;;  %v606_v49 = vmul.f32 %v604_v44, %v586_v39 }
 0x3ff   :  { %v589_v38 = vpop.permute.xlu0 %588 }
 0x400   :  { %v591_v40 = vmul.f32 %v589_v38, %v586_v39 }
 0x402   :  { %593 = vrot.lane.b32.xlu1 %v591_v40, %s1740_s12 }
 0x474   :  { %v594_v41 = vpop.permute.xlu1 %593 }
 0x475   :  { %v596_v42 = vadd.f32 %v594_v41, %v1996_v58 }
 0x477   :  { %1384 = vtanh.f32 %v596_v42 }
 0x47d   :  { %v1385_v43 = vpop.eup %1384 }
 0x47e   :  { %600 = vrot.lane.b32.xlu2 %v1385_v43, %s1741_s13 }
 0x4d8   :  { %v601_v47 = vpop.permute.xlu2 %600 }
 0x4d9   :  { %v603_v48 = vmul.f32 %v601_v47, %v598_v46 }
 0x4db   :  { %v2011_v50 = vadd.f32 %v606_v49, %v603_v48 }
 0x4dd   :  { %v614_v51 = vrot.slane %v2011_v50, 2  ;;  %v678_v16 = vrot.slane %v2011_v50, 6 }
 0x4df   :  { %615 = vrot.lane.b32.xlu0 %v614_v51, %s1741_s13 }
 0x551   :  { %v616_v52 = vpop.permute.xlu0 %615 }
 0x552   :  { %1317 = vmatmul.msk.f32.vlgmr.msrb.gmra.mxu1 %vm474_vm11, %v616_v52 }
 0x5cf   :  { %v636_v53 = vpop.f32.mrf.mxu1 }
 0x5d0   :  { %v637_v54 = vadd.f32 %v1987_v45, %v636_v53 }
 0x5d2   :  { %v640_v56 = vrot.slane %v637_v54, 4 }
 0x5d4   :  { %662 = vrot.lane.b32.xlu1 %v640_v56, %s1740_s12  ;;  %v642_v57 = vadd.f32 %v640_v56, %v1996_v58 }
 0x5d6   :  { %v1318_v59 = vmul.f32 -1.442695, %v642_v57 }
 0x5d8   :  { %1386 = vpow2.f32 %v1318_v59 }
 0x5de   :  { %v1387_v60 = vpop.eup %1386 }
 0x5df   :  { %v646_v61 = vadd.f32 1.0, %v1387_v60 }
 0x5e1   :  { %1388 = vrcp.f32 %v646_v61  ;;  %v658_v3 = vand.u32 2147483648, %v646_v61  ;;  %vm652_vm5 = vweird.f32 %v646_v61  ;;  %v656_v4 = vand.u32 2147483647, %v646_v61 }
 0x5e3   :  { %v659_v7 = vor.u32 1.1754944e-38, %v658_v3  ;;  %vm657_vm7 = vcmp.eq.f32.partialorder %v656_v4, 8.507059e+37 }
 0x5e7   :  { %v1389_v62 = vpop.eup %1388 }
 0x5e8   :  { %v648_v63 = vmul.f32 %v1389_v62, %v646_v61  ;;  %vm653_vm4 = vweird.f32 %v1389_v62 }
 0x5e9   :  { %vm654_vm6 = vmor %vm652_vm5, %vm653_vm4 }
 0x5ea   :  { %v649_v0 = vsub.f32 1.0, %v648_v63 }
 0x5ec   :  { %v650_v1 = vmul.f32 %v1389_v62, %v649_v0 }
 0x5ee   :  { %v651_v2 = vadd.f32 %v1389_v62, %v650_v1 }
 0x5f0   :  { %v655_v5 = vsel %vm654_vm6, %v1389_v62, %v651_v2 }
 0x5f1   :  { %v660_v10 = vsel %vm657_vm7, %v659_v7, %v655_v5 }
 0x5f2   :  { %v672_v15 = vsub.f32 1.0, %v660_v10  ;;  %v680_v18 = vmul.f32 %v678_v16, %v660_v10 }
 0x646   :  { %v663_v8 = vpop.permute.xlu1 %662 }
 0x647   :  { %v665_v11 = vmul.f32 %v663_v8, %v660_v10 }
 0x649   :  { %667 = vrot.lane.b32.xlu2 %v665_v11, %s1740_s12 }
 0x6a3   :  { %v668_v12 = vpop.permute.xlu2 %667 }
 0x6a4   :  { %v670_v13 = vadd.f32 %v668_v12, %v1996_v58 }
 0x6a6   :  { %1390 = vtanh.f32 %v670_v13 }
 0x6ac   :  { %v1391_v14 = vpop.eup %1390 }
 0x6ad   :  { %674 = vrot.lane.b32.xlu0 %v1391_v14, %s1741_s13 }
 0x71f   :  { %v675_v17 = vpop.permute.xlu0 %674 }
 0x720   :  { %v677_v19 = vmul.f32 %v675_v17, %v672_v15 }
 0x722   :  { %v2023_v20 = vadd.f32 %v680_v18, %v677_v19 }
 0x724   :  { %v688_v21 = vrot.slane %v2023_v20, 4  ;;  %v752_v47 = vrot.slane %v2023_v20, 6 }
 0x726   :  { %689 = vrot.lane.b32.xlu1 %v688_v21, %s1741_s13 }
 0x798   :  { %v690_v22 = vpop.permute.xlu1 %689 }
 0x799   :  { %1319 = vmatmul.msk.f32.vlgmr.msra.gmra.mxu2 %vm474_vm11, %v690_v22 }
 0x81c   :  { %v710_v23 = vpop.f32.mrf.mxu2 }
 0x81d   :  { %v711_v24 = vadd.f32 %v1987_v45, %v710_v23 }
 0x81f   :  { %v714_v25 = vrot.slane %v711_v24, 2 }
 0x821   :  { %736 = vrot.lane.b32.xlu2 %v714_v25, %s1740_s12  ;;  %v716_v26 = vadd.f32 %v714_v25, %v1996_v58 }
 0x823   :  { %v1320_v27 = vmul.f32 -1.442695, %v716_v26 }
 0x825   :  { %1392 = vpow2.f32 %v1320_v27 }
 0x82b   :  { %v1393_v28 = vpop.eup %1392 }
 0x82c   :  { %v720_v29 = vadd.f32 1.0, %v1393_v28 }
 0x82e   :  { %1394 = vrcp.f32 %v720_v29  ;;  %v732_v35 = vand.u32 2147483648, %v720_v29  ;;  %vm726_vm9 = vweird.f32 %v720_v29  ;;  %v730_v36 = vand.u32 2147483647, %v720_v29 }
 0x830   :  { %v733_v38 = vor.u32 1.1754944e-38, %v732_v35  ;;  %vm731_vm13 = vcmp.eq.f32.partialorder %v730_v36, 8.507059e+37 }
 0x834   :  { %v1395_v30 = vpop.eup %1394 }
 0x835   :  { %v722_v31 = vmul.f32 %v1395_v30, %v720_v29  ;;  %vm727_vm8 = vweird.f32 %v1395_v30 }
 0x836   :  { %vm728_vm12 = vmor %vm726_vm9, %vm727_vm8 }
 0x837   :  { %v723_v32 = vsub.f32 1.0, %v722_v31 }
 0x839   :  { %v724_v33 = vmul.f32 %v1395_v30, %v723_v32 }
 0x83b   :  { %v725_v34 = vadd.f32 %v1395_v30, %v724_v33 }
 0x83d   :  { %v729_v37 = vsel %vm728_vm12, %v1395_v30, %v725_v34 }
 0x83e   :  { %v734_v40 = vsel %vm731_vm13, %v733_v38, %v729_v37 }
 0x83f   :  { %v746_v46 = vsub.f32 1.0, %v734_v40  ;;  %v754_v49 = vmul.f32 %v752_v47, %v734_v40 }
 0x87b   :  { %v737_v39 = vpop.permute.xlu2 %736 }
 0x87c   :  { %v739_v41 = vmul.f32 %v737_v39, %v734_v40 }
 0x87e   :  { %741 = vrot.lane.b32.xlu0 %v739_v41, %s1740_s12 }
 0x8f0   :  { %v742_v42 = vpop.permute.xlu0 %741 }
 0x8f1   :  { %v744_v43 = vadd.f32 %v742_v42, %v1996_v58 }
 0x8f3   :  { %1396 = vtanh.f32 %v744_v43 }
 0x8f9   :  { %v1397_v44 = vpop.eup %1396 }
 0x8fa   :  { %748 = vrot.lane.b32.xlu1 %v1397_v44, %s1741_s13 }
 0x96c   :  { %v749_v48 = vpop.permute.xlu1 %748 }
 0x96d   :  { %v751_v51 = vmul.f32 %v749_v48, %v746_v46 }
 0x96f   :  { %v2035_v52 = vadd.f32 %v754_v49, %v751_v51 }
 0x971   :  { %v762_v53 = vrot.slane %v2035_v52, 6 }
 0x973   :  { %763 = vrot.lane.b32.xlu2 %v762_v53, %s1741_s13 }
 0x9cd   :  { %v764_v54 = vpop.permute.xlu2 %763 }
 0x9ce   :  { %1321 = vmatmul.msk.f32.vlgmr.msra.gmra.mxu3 %vm474_vm11, %v764_v54 }
 0xa51   :  { %v784_v58 = vpop.f32.mrf.mxu3 }
 0xa52   :  { %v785_v56 = vadd.f32 %v1987_v45, %v784_v58 }
 0xa54   :  { %808 = vrot.lane.b32.xlu0 %v785_v56, %s1740_s12  ;;  %v787_v57 = vadd.f32 %v785_v56, %v1994_v55 }
 0xa56   :  { %v1322_v59 = vmul.f32 -1.442695, %v787_v57 }
 0xa58   :  { %1398 = vpow2.f32 %v1322_v59 }
 0xa5e   :  { %v1399_v60 = vpop.eup %1398 }
 0xa5f   :  { %v791_v61 = vadd.f32 1.0, %v1399_v60 }
 0xa61   :  { %1400 = vrcp.f32 %v791_v61  ;;  %v803_v3 = vand.u32 2147483648, %v791_v61  ;;  %vm797_vm15 = vweird.f32 %v791_v61  ;;  %v801_v4 = vand.u32 2147483647, %v791_v61 }
 0xa63   :  { %v804_v7 = vor.u32 1.1754944e-38, %v803_v3  ;;  %vm802_vm5 = vcmp.eq.f32.partialorder %v801_v4, 8.507059e+37 }
 0xa67   :  { %v1401_v62 = vpop.eup %1400 }
 0xa68   :  { %v793_v63 = vmul.f32 %v1401_v62, %v791_v61  ;;  %vm798_vm14 = vweird.f32 %v1401_v62 }
 0xa69   :  { %vm799_vm4 = vmor %vm797_vm15, %vm798_vm14 }
 0xa6a   :  { %v794_v0 = vsub.f32 1.0, %v793_v63 }
 0xa6c   :  { %v795_v1 = vmul.f32 %v1401_v62, %v794_v0 }
 0xa6e   :  { %v796_v2 = vadd.f32 %v1401_v62, %v795_v1 }
 0xa70   :  { %v800_v5 = vsel %vm799_vm4, %v1401_v62, %v796_v2 }
 0xa71   :  { %v805_v10 = vsel %vm802_vm5, %v804_v7, %v800_v5 }
 0xa72   :  { %v818_v15 = vsub.f32 1.0, %v805_v10  ;;  %v825_v17 = vmul.f32 %v805_v10, %v762_v53 }
 0xac6   :  { %v809_v8 = vpop.permute.xlu0 %808 }
 0xac7   :  { %v811_v11 = vmul.f32 %v809_v8, %v805_v10 }
 0xac9   :  { %813 = vrot.lane.b32.xlu1 %v811_v11, %s1740_s12 }
 0xb3b   :  { %v814_v12 = vpop.permute.xlu1 %813 }
 0xb3c   :  { %v816_v13 = vadd.f32 %v814_v12, %v1994_v55 }
 0xb3e   :  { %1402 = vtanh.f32 %v816_v13 }
 0xb44   :  { %v1403_v14 = vpop.eup %1402 }
 0xb45   :  { %820 = vrot.lane.b32.xlu2 %v1403_v14, %s1741_s13 }
 0xb9f   :  { %v821_v16 = vpop.permute.xlu2 %820 }
 0xba0   :  { %v823_v18 = vmul.f32 %v821_v16, %v818_v15 }
 0xba2   :  { %v826_v19 = vadd.f32 %v825_v17, %v823_v18 }
 0xba4   :  { %828 = vrot.lane.b32.xlu0 %v826_v19, %s1741_s13  ;;  %v893_v44 = vrot.slane %v826_v19, 6 }
 0xc16   :  { %v829_v21 = vpop.permute.xlu0 %828 }
 0xc17   :  { %831 = vst.msk [vmem:[#allocation2 + $0x8] sm:$0x3] %vm541_vm10, %v829_v21  ;;  %1323 = vmatmul.msk.f32.vlgmr.msra.gmra.mxu1 %vm474_vm11, %v829_v21 }
 0xc94   :  { %v851_v22 = vpop.f32.mrf.mxu1 }
 0xc95   :  { %v852_v23 = vadd.f32 %v1987_v45, %v851_v22 }
 0xc97   :  { %v855_v24 = vrot.slane %v852_v23, 6 }
 0xc99   :  { %877 = vrot.lane.b32.xlu1 %v855_v24, %s1740_s12  ;;  %v857_v25 = vadd.f32 %v855_v24, %v1994_v55 }
 0xc9b   :  { %v1324_v26 = vmul.f32 -1.442695, %v857_v25 }
 0xc9d   :  { %1404 = vpow2.f32 %v1324_v26 }
 0xca3   :  { %v1405_v27 = vpop.eup %1404 }
 0xca4   :  { %v861_v28 = vadd.f32 1.0, %v1405_v27 }
 0xca6   :  { %1406 = vrcp.f32 %v861_v28  ;;  %v873_v34 = vand.u32 2147483648, %v861_v28  ;;  %vm867_vm6 = vweird.f32 %v861_v28  ;;  %v871_v35 = vand.u32 2147483647, %v861_v28 }
 0xca8   :  { %v874_v37 = vor.u32 1.1754944e-38, %v873_v34  ;;  %vm872_vm8 = vcmp.eq.f32.partialorder %v871_v35, 8.507059e+37  ;;  %v1054_v35 = vld [vmem:[#allocation11] sm:$0xf] }
 0xca9   :  { %1329 = vmatpush.msk.msrb.mxu3 %vm266_vm0, %v1054_v35  ;;  %v1254_v35 = vld [vmem:[%s2193_s24 + $0x38] sm:$0xff] }
 0xcac   :  { %v1407_v29 = vpop.eup %1406 }
 0xcad   :  { %v863_v30 = vmul.f32 %v1407_v29, %v861_v28  ;;  %vm868_vm10 = vweird.f32 %v1407_v29 }
 0xcae   :  { %vm869_vm7 = vmor %vm867_vm6, %vm868_vm10  ;;  %vm1288_vm10 = vcmask 15360  }
 0xcaf   :  { %v864_v31 = vsub.f32 1.0, %v863_v30 }
 0xcb1   :  { %v865_v32 = vmul.f32 %v1407_v29, %v864_v31 }
 0xcb3   :  { %v866_v33 = vadd.f32 %v1407_v29, %v865_v32 }
 0xcb5   :  { %v870_v36 = vsel %vm869_vm7, %v1407_v29, %v866_v33 }
 0xcb6   :  { %v875_v39 = vsel %vm872_vm8, %v874_v37, %v870_v36  ;;  %v1050_v36 = vld [vmem:[%s2185_s16] sm:$0xff] }
 0xcb7   :  { %v887_v46 = vsub.f32 1.0, %v875_v39  ;;  %v895_v49 = vmul.f32 %v893_v44, %v875_v39 }
 0xd0b   :  { %v878_v38 = vpop.permute.xlu1 %877 }
 0xd0c   :  { %v880_v40 = vmul.f32 %v878_v38, %v875_v39 }
 0xd0e   :  { %882 = vrot.lane.b32.xlu2 %v880_v40, %s1740_s12 }
 0xd68   :  { %v883_v41 = vpop.permute.xlu2 %882 }
 0xd69   :  { %v885_v42 = vadd.f32 %v883_v41, %v1994_v55 }
 0xd6b   :  { %1408 = vtanh.f32 %v885_v42 }
 0xd71   :  { %v1409_v43 = vpop.eup %1408 }
 0xd72   :  { %889 = vrot.lane.b32.xlu0 %v1409_v43, %s1741_s13 }
 0xde4   :  { %v890_v47 = vpop.permute.xlu0 %889 }
 0xde5   :  { %v892_v48 = vmul.f32 %v890_v47, %v887_v46 }
 0xde7   :  { %v896_v51 = vadd.f32 %v895_v49, %v892_v48 }
 0xde9   :  { %v902_v53 = vrot.slane %v896_v51, 2  ;;  %v966_v17 = vrot.slane %v896_v51, 6 }
 0xdeb   :  { %903 = vrot.lane.b32.xlu1 %v902_v53, %s1741_s13 }
 0xe5d   :  { %v904_v54 = vpop.permute.xlu1 %903 }
 0xe5e   :  { %1325 = vmatmul.msk.f32.vlgmr.msrb.gmra.mxu0 %vm474_vm11, %v904_v54  ;;  %v1132_v54 = vld [vmem:[#allocation14 + $0x18] sm:$0xff] }
 0xe5f   :  { %1184 = vmatpush.msra.mxu2 %v1132_v54 }
 0xedb   :  { %v924_v58 = vpop.f32.mrf.mxu0 }
 0xedc   :  { %v925_v56 = vadd.f32 %v1987_v45, %v924_v58  ;;  %v1131_v58 = vld [vmem:[#allocation14 + $0x10] sm:$0xff] }
 0xedd   :  { %1185 = vmatpush.msra.mxu2 %v1131_v58 }
 0xede   :  { %v928_v57 = vrot.slane %v925_v56, 4 }
 0xee0   :  { %950 = vrot.lane.b32.xlu2 %v928_v57, %s1740_s12  ;;  %v930_v59 = vadd.f32 %v928_v57, %v1994_v55 }
 0xee2   :  { %v1326_v60 = vmul.f32 -1.442695, %v930_v59  ;;  %v1136_v59 = vld [vmem:[#allocation16 + $0x18] sm:$0xff] }
 0xee3   :  { %1155 = vmatpush.msra.mxu0 %v1136_v59 }
 0xee4   :  { %1410 = vpow2.f32 %v1326_v60  ;;  %v1130_v60 = vld [vmem:[#allocation14 + $0x8] sm:$0xff] }
 0xee5   :  { %1186 = vmatpush.msra.mxu2 %v1130_v60 }
 0xeea   :  { %v1411_v61 = vpop.eup %1410 }
 0xeeb   :  { %v934_v62 = vadd.f32 1.0, %v1411_v61  ;;  %v1370_v61 = vld [vmem:[#allocation13] ss:$0 sm:$0xff] }
 0xeed   :  { %1412 = vrcp.f32 %v934_v62  ;;  %v946_v4 = vand.u32 2147483648, %v934_v62  ;;  %vm940_vm12 = vweird.f32 %v934_v62  ;;  %v944_v5 = vand.u32 2147483647, %v934_v62 }
 0xeef   :  { %v947_v8 = vor.u32 1.1754944e-38, %v946_v4  ;;  %vm945_vm14 = vcmp.eq.f32.partialorder %v944_v5, 8.507059e+37 }
 0xef3   :  { %v1413_v63 = vpop.eup %1412 }
 0xef4   :  { %v936_v0 = vmul.f32 %v1413_v63, %v934_v62  ;;  %vm941_vm9 = vweird.f32 %v1413_v63  ;;  %v1129_v62 = vld [vmem:[#allocation14] sm:$0xff] }
 0xef5   :  { %vm942_vm13 = vmor %vm940_vm12, %vm941_vm9  ;;  %1187 = vmatpush.msra.mxu2 %v1129_v62 }
 0xef6   :  { %v937_v1 = vsub.f32 1.0, %v936_v0  ;;  %v1135_v0 = vld [vmem:[#allocation16 + $0x10] sm:$0xff] }
 0xef7   :  { %1156 = vmatpush.msra.mxu0 %v1135_v0 }
 0xef8   :  { %v938_v2 = vmul.f32 %v1413_v63, %v937_v1  ;;  %v1134_v1 = vld [vmem:[#allocation16 + $0x8] sm:$0xff] }
 0xef9   :  { %1157 = vmatpush.msra.mxu0 %v1134_v1 }
 0xefa   :  { %v939_v3 = vadd.f32 %v1413_v63, %v938_v2 }
 0xefc   :  { %v943_v7 = vsel %vm942_vm13, %v1413_v63, %v939_v3 }
 0xefd   :  { %v948_v11 = vsel %vm945_vm14, %v947_v8, %v943_v7 }
 0xefe   :  { %v960_v16 = vsub.f32 1.0, %v948_v11  ;;  %v968_v19 = vmul.f32 %v966_v17, %v948_v11 }
 0xf3a   :  { %v951_v10 = vpop.permute.xlu2 %950 }
 0xf3b   :  { %v953_v12 = vmul.f32 %v951_v10, %v948_v11 }
 0xf3d   :  { %955 = vrot.lane.b32.xlu0 %v953_v12, %s1740_s12 }
 0xfaf   :  { %v956_v13 = vpop.permute.xlu0 %955 }
 0xfb0   :  { %v958_v14 = vadd.f32 %v956_v13, %v1994_v55 }
 0xfb2   :  { %1414 = vtanh.f32 %v958_v14 }
 0xfb8   :  { %v1415_v15 = vpop.eup %1414 }
 0xfb9   :  { %962 = vrot.lane.b32.xlu1 %v1415_v15, %s1741_s13 }
0x102b   :  { %v963_v18 = vpop.permute.xlu1 %962 }
0x102c   :  { %v965_v21 = vmul.f32 %v963_v18, %v960_v16  ;;  %v1210_v18 = vld [vmem:[%s2191_s22 + $0x38] sm:$0xff] }
0x102d   :  { %1230 = vmatpush.msra.mxu3 %v1210_v18 }
0x102e   :  { %v2063_v22 = vadd.f32 %v968_v19, %v965_v21  ;;  %v1209_v19 = vld [vmem:[%s2191_s22 + $0x30] sm:$0xff]  ;;  %v1208_v21 = vld [vmem:[%s2191_s22 + $0x28] sm:$0xff] }
0x102f   :  { %1231 = vmatpush.msra.mxu3 %v1209_v19 }
0x1030   :  { %v975_v23 = vrot.slane %v2063_v22, 4  ;;  %v1039_v4 = vrot.slane %v2063_v22, 6 }
0x1031   :  { %1232 = vmatpush.msra.mxu3 %v1208_v21 }
0x1032   :  { %976 = vrot.lane.b32.xlu2 %v975_v23, %s1741_s13 }
0x108c   :  { %v977_v24 = vpop.permute.xlu2 %976 }
0x108d   :  { %1327 = vmatmul.msk.f32.vlgmr.msrb.gmra.mxu2 %vm474_vm11, %v977_v24 }
0x1110   :  { %v997_v25 = vpop.f32.mrf.mxu2 }
0x1111   :  { %v998_v26 = vadd.f32 %v1987_v45, %v997_v25  ;;  %v1052_v45 = vld [vmem:[%s2222_s8] sm:$0xff]  ;;  %v1206_v25 = vld [vmem:[%s2191_s22 + $0x18] sm:$0xff] }
0x1112   :  { %1330 = vmatmul.msk.f32.vlgmr.msrb.gmra.mxu3 %vm259_vm1, %v1052_v45  ;;  %v1253_v45 = vld [vmem:[%s2193_s24 + $0x30] sm:$0xff] }
0x1113   :  { %v1001_v27 = vrot.slane %v998_v26, 2  ;;  %v1205_v26 = vld [vmem:[%s2191_s22 + $0x10] sm:$0xff] }
0x1115   :  { %1023 = vrot.lane.b32.xlu0 %v1001_v27, %s1740_s12  ;;  %v1003_v28 = vadd.f32 %v1001_v27, %v1994_v55  ;;  %v1204_v27 = vld [vmem:[%s2191_s22 + $0x8] sm:$0xff] }
0x1117   :  { %v1328_v29 = vmul.f32 -1.442695, %v1003_v28  ;;  %v1203_v28 = vld [vmem:[%s2191_s22] sm:$0xff] }
0x1119   :  { %1416 = vpow2.f32 %v1328_v29 }
0x111d   :  { %609 = vrot.lane.b32.xlu0 %v2011_v50, %s1741_s13  ;;  %v1051_v50 = vld [vmem:[%s2185_s16 + $0x8] sm:$0x3] }
0x111e   :  { %1332 = vmatpush.msk.msrb.mxu1 %vm336_vm2, %v1051_v50  ;;  %vm612_vm2 = vcmask 257026   ;;  %v1252_v50 = vld [vmem:[%s2193_s24 + $0x28] sm:$0xff] }
0x111f   :  { %v1417_v30 = vpop.eup %1416 }
0x1120   :  { %v1007_v31 = vadd.f32 1.0, %v1417_v30  ;;  %1111 = vmatpush.msrb.mxu1 %v1050_v36  ;;  %v1371_v30 = vld [vmem:[#allocation17] ss:$0 sm:$0xff]  ;;  %v1251_v36 = vld [vmem:[%s2193_s24 + $0x20] sm:$0xff] }
0x1121   :  { %1333 = vmatmul.msk.f32.vlgmr.msrb.gmra.mxu1 %vm329_vm3, %v1955_v9 }
0x1122   :  { %1418 = vrcp.f32 %v1007_v31  ;;  %v1019_v39 = vand.u32 2147483648, %v1007_v31  ;;  %vm1013_vm4 = vweird.f32 %v1007_v31  ;;  %v1017_v40 = vand.u32 2147483647, %v1007_v31  ;;  %1273 = vmatpush.msra.mxu1 %v1254_v35 }
0x1124   :  { %v1020_v42 = vor.u32 1.1754944e-38, %v1019_v39  ;;  %vm1018_vm0 = vcmp.eq.f32.partialorder %v1017_v40, 8.507059e+37  ;;  %1274 = vmatpush.msra.mxu1 %v1253_v45 }
0x1125   :  { %898 = vrot.lane.b32.xlu0 %v896_v51, %s1741_s13 }
0x1126   :  { %1275 = vmatpush.msra.mxu1 %v1252_v50 }
0x1128   :  { %v1419_v32 = vpop.eup %1418  ;;  %1276 = vmatpush.msra.mxu1 %v1251_v36 }
0x1129   :  { %v1009_v33 = vmul.f32 %v1419_v32, %v1007_v31  ;;  %vm1014_vm15 = vweird.f32 %v1419_v32  ;;  %1334 = vmatmul.msk.f32.gmra.mxu1 %vm329_vm3, %v1940_v6  ;;  %v1053_v6 = vld [vmem:[%s2222_s8 + $0x8] sm:$0xff]  ;;  %vm686_vm3 = vcmask 259076  }
0x112a   :  { %vm1015_vm5 = vmor %vm1013_vm4, %vm1014_vm15  ;;  %1331 = vmatmul.msk.f32.gmra.mxu3 %vm259_vm1, %v1053_v6  ;;  %vm760_vm1 = vcmask 261126  }
0x112b   :  { %v1010_v34 = vsub.f32 1.0, %v1009_v33 }
0x112d   :  { %v1011_v37 = vmul.f32 %v1419_v32, %v1010_v34 }
0x112f   :  { %v1012_v38 = vadd.f32 %v1419_v32, %v1011_v37  ;;  %v1250_v37 = vld [vmem:[%s2193_s24 + $0x18] sm:$0xff] }
0x1130   :  { %1277 = vmatpush.msra.mxu1 %v1250_v37 }
0x1131   :  { %v1016_v41 = vsel %vm1015_vm5, %v1419_v32, %v1012_v38 }
0x1132   :  { %v1021_v44 = vsel %vm1018_vm0, %v1020_v42, %v1016_v41 }
0x1133   :  { %v1033_v3 = vsub.f32 1.0, %v1021_v44  ;;  %v1041_v7 = vmul.f32 %v1039_v4, %v1021_v44 }
0x1187   :  { %v1024_v43 = vpop.permute.xlu0 %1023 }
0x1188   :  { %v1026_v46 = vmul.f32 %v1024_v43, %v1021_v44  ;;  %v1249_v43 = vld [vmem:[%s2193_s24 + $0x10] sm:$0xff]  ;;  %v1248_v44 = vld [vmem:[%s2193_s24 + $0x8] sm:$0xff] }
0x1189   :  { %1278 = vmatpush.msra.mxu1 %v1249_v43 }
0x118a   :  { %1028 = vrot.lane.b32.xlu1 %v1026_v46, %s1740_s12  ;;  %v1247_v46 = vld [vmem:[%s2193_s24] sm:$0xff] }
0x118b   :  { %1279 = vmatpush.msra.mxu1 %v1248_v44 }
0x118d   :  { %1280 = vmatpush.msra.mxu1 %v1247_v46 }
0x118f   :  { %v610_v47 = vpop.permute.xlu0 %609 }
0x1190   :  { %613 = vst.msk [vmem:[#allocation2] sm:$0xc] %vm612_vm2, %v610_v47  ;;  %v1372_v47 = vld [vmem:[#allocation19] ss:$0 sm:$0xff] }
0x1192   :  { %683 = vrot.lane.b32.xlu1 %v2023_v20, %s1741_s13 }
0x1195   :  { %v1081_v56 = vpop.f32.mrf.mxu3 }
0x1197   :  { %v899_v9 = vpop.permute.xlu0 %898 }
0x1198   :  { %901 = vst.msk [vmem:[#allocation2 + $0x8] sm:$0xc] %vm612_vm2, %v899_v9 }
0x119a   :  { %971 = vrot.lane.b32.xlu1 %v2063_v22, %s1741_s13  ;;  %v1207_v22 = vld [vmem:[%s2191_s22 + $0x20] sm:$0xff] }
0x119b   :  { %1233 = vmatpush.msra.mxu3 %v1207_v22 }
0x119d   :  { %1234 = vmatpush.msra.mxu3 %v1206_v25 }
0x119e   :  { %v1113_v57 = vpop.f32.mrf.mxu1 }
0x119f   :  { %1235 = vmatpush.msra.mxu3 %v1205_v26 }
0x11a1   :  { %1236 = vmatpush.msra.mxu3 %v1204_v27 }
0x11a3   :  { %1237 = vmatpush.msra.mxu3 %v1203_v28 }
0x11a6   :  { %v1116_v14 = vpop.f32.mrf.mxu1 }
0x11ad   :  { %v1084_v13 = vpop.f32.mrf.mxu3 }
0x11ae   :  { %v1117_v15 = vadd.f32 %v1116_v14, %v1084_v13 }
0x11b0   :  { %v1124_v16 = vadd.f32 %v1370_v61, %v1117_v15 }
0x11b2   :  { %v1126_v17 = vmax.f32 %v1124_v16, 0.0 }
0x11fc   :  { %v1029_v48 = vpop.permute.xlu1 %1028 }
0x11fd   :  { %v1031_v49 = vadd.f32 %v1029_v48, %v1994_v55  ;;  %v1114_v55 = vadd.f32 %v1113_v57, %v1081_v56 }
0x11ff   :  { %1420 = vtanh.f32 %v1031_v49  ;;  %v1123_v63 = vadd.f32 %v1370_v61, %v1114_v55 }
0x1201   :  { %v1125_v2 = vmax.f32 %v1123_v63, 0.0 }
0x1204   :  { %v684_v51 = vpop.permute.xlu1 %683 }
0x1205   :  { %v1421_v53 = vpop.eup %1420  ;;  %687 = vst.msk [vmem:[#allocation2] sm:$0x30] %vm686_vm3, %v684_v51 }
0x1206   :  { %1035 = vrot.lane.b32.xlu2 %v1421_v53, %s1741_s13 }
0x120c   :  { %v972_v20 = vpop.permute.xlu1 %971 }
0x120d   :  { %974 = vst.msk [vmem:[#allocation2 + $0x8] sm:$0x30] %vm686_vm3, %v972_v20  ;;  %v1373_v20 = vld [vmem:[#allocation20] ss:$0 sm:$0xff] }
0x120e   :  { %757 = vrot.lane.b32.xlu2 %v2035_v52, %s1741_s13  ;;  %v1133_v52 = vld [vmem:[#allocation16] sm:$0xff] }
0x120f   :  { %1158 = vmatpush.msra.mxu0 %v1133_v52 }
0x1210   :  { %1335 = vmatmul.msk.f32.vlgmr.msra.gmra.mxu0 %vm474_vm11, %v1125_v2 }
0x1218   :  { %1336 = vmatmul.msk.f32.gmra.mxu0 %vm474_vm11, %v1126_v17 }
0x1260   :  { %v1036_v5 = vpop.permute.xlu2 %1035 }
0x1261   :  { %v1038_v8 = vmul.f32 %v1036_v5, %v1033_v3 }
0x1263   :  { %v1042_v10 = vadd.f32 %v1041_v7, %v1038_v8 }
0x1265   :  { %1044 = vrot.lane.b32.xlu2 %v1042_v10, %s1741_s13 }
0x1268   :  { %v758_v11 = vpop.permute.xlu2 %757 }
0x1269   :  { %761 = vst.msk [vmem:[#allocation2] sm:$0xc0] %vm760_vm1, %v758_v11 }
0x1270   :  { %v1127_v12 = vld [vmem:[#allocation2] sm:$0xff] }
0x1271   :  { %1337 = vmatmul.msk.f32.vlgmr.msra.gmra.mxu2 %vm474_vm11, %v1127_v12 }
0x128d   :  { %v1160_v29 = vpop.f32.mrf.mxu0 }
0x1295   :  { %v1163_v38 = vpop.f32.mrf.mxu0 }
0x12bf   :  { %v1045_v23 = vpop.permute.xlu2 %1044 }
0x12c0   :  { %1047 = vst.msk [vmem:[#allocation2 + $0x8] sm:$0xc0] %vm760_vm1, %v1045_v23 }
0x12c7   :  { %v1128_v24 = vld [vmem:[#allocation2 + $0x8] sm:$0xff] }
0x12c8   :  { %1338 = vmatmul.msk.f32.gmra.mxu2 %vm474_vm11, %v1128_v24  ;;  %vm1215_vm11 = vcmask 523264  }
0x12f4   :  { %v1189_v31 = vpop.f32.mrf.mxu2 }
0x12f5   :  { %v1190_v32 = vadd.f32 %v1189_v31, %v1160_v29 }
0x12f7   :  { %v1199_v33 = vadd.f32 %v1371_v30, %v1190_v32 }
0x12f9   :  { %v1201_v34 = vmax.f32 %v1199_v33, 0.0 }
0x12fb   :  { %1339 = vmatmul.msk.f32.vlgmr.msra.gmra.mxu3 %vm1215_vm11, %v1201_v34 }
0x134b   :  { %v1192_v39 = vpop.f32.mrf.mxu2 }
0x134c   :  { %v1193_v40 = vadd.f32 %v1192_v39, %v1163_v38 }
0x134e   :  { %v1200_v41 = vadd.f32 %v1371_v30, %v1193_v40 }
0x1350   :  { %v1202_v42 = vmax.f32 %v1200_v41, 0.0 }
0x1352   :  { %1340 = vmatmul.msk.f32.gmra.mxu3 %vm1215_vm11, %v1202_v42 }
0x137e   :  { %v1239_v9 = vpop.f32.mrf.mxu3 }
0x137f   :  { %v1240_v6 = vadd.f32 %v1372_v47, %v1239_v9 }
0x1381   :  { %v1245_v48 = vmax.f32 %v1240_v6, 0.0 }
0x1383   :  { %1341 = vmatmul.msk.f32.vlgmr.msra.gmra.mxu1 %vm1215_vm11, %v1245_v48 }
0x13d5   :  { %v1242_v49 = vpop.f32.mrf.mxu3 }
0x13d6   :  { %v1243_v51 = vadd.f32 %v1372_v47, %v1242_v49 }
0x13d8   :  { %v1246_v53 = vmax.f32 %v1243_v51, 0.0 }
0x13da   :  { %1342 = vmatmul.msk.f32.gmra.mxu1 %vm1215_vm11, %v1246_v53 }
0x1400   :  { %v1282_v54 = vpop.f32.mrf.mxu1 }
0x1401   :  { %v1283_v58 = vadd.f32 %v1373_v20, %v1282_v54 }
0x1403   :  { %1289 = vst.msk [vmem:[%s2195_s26] sm:$0xff] %vm1288_vm10, %v1283_v58 }
0x1457   :  { %v1285_v56 = vpop.f32.mrf.mxu1 }
0x1458   :  { %v1286_v57 = vadd.f32 %v1373_v20, %v1285_v56 }
0x145a   :  { %1290 = vst.msk [vmem:[%s2195_s26 + $0x8] sm:$0xff] %vm1288_vm10, %v1286_v57 }
0x145b   :  { %1295 = vsyncpa [#allocation4], 1 }
0x145c   :  { %1296 = vsyncpa [#allocation6], 1 }
0x145d   :  { %1297 = vsyncpa [#allocation9], 1 }
0x145e   :  { %1298 = vsyncpa [#allocation12], 1 }
0x145f   :  { %1299 = vsyncpa [#allocation15], 1 }
0x1460   :  { %1300 = vsyncpa [#allocation18], 1 }
0x1461   :  { %1301 = vsyncpa [#allocation21], 1 }

</bundles_post_ra>
